<compile_context>
chip_gen: v7x
topology: tpu7x:2x2x1
jax: 0.10.0
libtpu: 0.0.40
codegen_flags: <defaults>
</compile_context>

<pallas_src>
import functools

import jax
import jax.numpy as jnp
from jax import lax
from jax.experimental import pallas as pl
from jax.experimental.pallas import tpu as pltpu


def _round_up(x: int, m: int) -> int:
    return (x + m - 1) // m * m


def _vmem_capacity_bytes() -> int:
    try:
        return int(pltpu.get_tpu_info().vmem_capacity_bytes)
    except Exception:
        return 64 * 1024 * 1024  # conservative fallback (v7x per-TC)


# --------------------------------------------------------------------------
# Kernels
# --------------------------------------------------------------------------
def _resident_kernel(x_ref, wt_ref, b_ref, o_ref, *, num_layers: int,
                     compute_dtype, precision):
    """All layers in one grid step; weights/biases are VMEM-resident.

    x_ref : (tile_m, Dp)         activation tile, compute dtype (pipelined)
    wt_ref: (L, Dp, Dp)          pre-transposed weights (single-buffered VMEM)
    b_ref : (L, 1, Dp) fp32      biases (single-buffered VMEM)
    o_ref : (tile_m, Dp) fp32    output tile
    """
    x = x_ref[...]

    def layer(l, a):
        acc = jnp.dot(a, wt_ref[l], preferred_element_type=jnp.float32,
                      precision=precision)
        return jnp.maximum(acc + b_ref[l], 0.0)      # fp32 bias + ReLU (VPU)

    if num_layers <= 4:
        # Short stack: fully unrolled, one MXU matmul + fp32 epilogue per layer.
        for l in range(num_layers - 1):
            x = layer(l, x).astype(compute_dtype)
    else:
        # Deep stack: bound live ranges to ~1 layer with a real loop.
        x = lax.fori_loop(0, num_layers - 1,
                          lambda l, a: layer(l, a).astype(compute_dtype),
                          x, unroll=2)

    # Final layer: keep fp32 all the way to the store.
    o_ref[...] = layer(num_layers - 1, x).astype(o_ref.dtype)


def _streaming_kernel(x_ref, wt_ref, b_ref, o_ref, act_ref, *, precision):
    """One layer per grid step; weights streamed (double-buffered) per layer.

    grid = (row_tiles, num_layers); layer axis is "arbitrary" (innermost).
    x_ref : (tile_m, Dp)      input tile (same block across the layer axis)
    wt_ref: (1, Dp, Dp)       this layer's pre-transposed weight
    b_ref : (1, 1, Dp) fp32   this layer's bias
    o_ref : (tile_m, Dp) fp32 output tile (written only on the last layer)
    act_ref: VMEM scratch (tile_m, Dp) compute dtype, carried across layers
    """
    l = pl.program_id(1)

    @pl.when(l == 0)
    def _():
        act_ref[...] = x_ref[...]

    acc = jnp.dot(act_ref[...], wt_ref[0], preferred_element_type=jnp.float32,
                  precision=precision)
    y = jnp.maximum(acc + b_ref[0], 0.0)             # fp32 bias + ReLU
    act_ref[...] = y.astype(act_ref.dtype)

    @pl.when(l == pl.num_programs(1) - 1)
    def _():
        o_ref[...] = y.astype(o_ref.dtype)


# --------------------------------------------------------------------------
# Parameter preparation (hoisted out of the per-call hot path)
# --------------------------------------------------------------------------
def prepare_energy_projection_params(weights, biases, *,
                                     compute_dtype=jnp.bfloat16):
    """Pad, transpose and cast the Linear stack ONCE.

    weights: (L, D, D) fp32, PyTorch Linear convention (out_features, in_features)
    biases : (L, D)    fp32
    """
    num_layers, d, d2 = weights.shape
    assert d == d2, "EnergyProjection uses square Linear layers"
    d_pad = max(128, _round_up(d, 128))
    w_pad = jnp.pad(weights, ((0, 0), (0, d_pad - d), (0, d_pad - d)))
    wt = jnp.transpose(w_pad, (0, 2, 1)).astype(compute_dtype)   # (L, Dp, Dp) = W.T
    b = jnp.pad(biases, ((0, 0), (0, d_pad - d)))
    b = b.reshape(num_layers, 1, d_pad).astype(jnp.float32)      # (L, 1, Dp)
    return {"wt": wt, "b": b, "model_dim": int(d),
            "compute_dtype": compute_dtype}


# --------------------------------------------------------------------------
# Forward
# --------------------------------------------------------------------------
def energy_projection_prepared(seqs, params, *, tile_m=None,
                               force_streaming=False):
    """seqs: (batch, seq, D) fp32 -> (batch, seq, D) fp32."""
    wt, b3d = params["wt"], params["b"]
    d = params["model_dim"]
    compute_dtype = params["compute_dtype"]
    num_layers, d_pad, _ = wt.shape

    batch, seq, d_in = seqs.shape
    assert d_in == d
    m = batch * seq
    cb = jnp.dtype(compute_dtype).itemsize
    fp32_compute = jnp.dtype(compute_dtype) == jnp.dtype(jnp.float32)
    precision = lax.Precision.HIGHEST if fp32_compute else None

    # VMEM budget: physical capacity minus ~15% headroom for Mosaic scratch.
    budget = int(_vmem_capacity_bytes() * 0.85)

    weight_bytes = num_layers * d_pad * d_pad * cb
    bias_bytes = num_layers * d_pad * 4

    # Per-row VMEM footprint of a tile: double-buffered input (compute dtype),
    # double-buffered fp32 output, plus in-kernel fp32 accumulator + recast.
    per_row_resident = d_pad * (2 * cb + 2 * 4 + 2 * (4 + cb))
    per_row_stream = d_pad * (2 * cb + 2 * 4 + cb + (4 + cb))
    min_tile = 16  # bf16 sublane packing; also multiple of 8 for fp32

    resident_ok = (not force_streaming) and (
        weight_bytes + bias_bytes + min_tile * per_row_resident <= budget)

    def pick_tile(per_row, fixed_bytes):
        if tile_m is not None:
            t = _round_up(max(int(tile_m), min_tile), min_tile)
        else:
            t = 512  # big tiles amortize ~0.35us/step overhead on 128MiB parts
        avail = max(budget - fixed_bytes, min_tile * per_row)
        t = min(t, max(min_tile, (avail // per_row) // min_tile * min_tile))
        t = min(t, _round_up(m, min_tile))            # don't over-pad tiny M
        if tile_m is None and m > min_tile:
            # >= 2 row-grid steps so the "parallel" axis can feed both v7x TCs.
            t = min(t, _round_up(-(-m // 2), min_tile))
        return max(t, min_tile)

    if resident_ok:
        t = pick_tile(per_row_resident, weight_bytes + bias_bytes)
        need = weight_bytes + bias_bytes + t * per_row_resident
    else:
        # Streaming: only 2 layers of weights live (double-buffered).
        stream_fixed = 2 * (d_pad * d_pad * cb + d_pad * 4)
        t = pick_tile(per_row_stream, stream_fixed)
        need = stream_fixed + t * per_row_stream

    m_pad = _round_up(m, t)
    rows = m_pad // t
    vmem_limit = int(min(budget, max(int(need * 1.3), 16 * 1024 * 1024)))

    # Activation slab: cast to compute dtype in the wrapper (halves HBM in).
    x2d = seqs.reshape(m, d).astype(compute_dtype)
    x2d = jnp.pad(x2d, ((0, m_pad - m), (0, d_pad - d)))

    flops = 2 * num_layers * m_pad * d_pad * d_pad

    if resident_ok:
        kernel = functools.partial(_resident_kernel, num_layers=num_layers,
                                   compute_dtype=compute_dtype,
                                   precision=precision)
        bytes_accessed = (m_pad * d_pad * (cb + 4) + weight_bytes + bias_bytes)
        out2d = pl.pallas_call(
            kernel,
            out_shape=jax.ShapeDtypeStruct((m_pad, d_pad), seqs.dtype),
            grid_spec=pltpu.PrefetchScalarGridSpec(
                num_scalar_prefetch=0,
                grid=(rows,),
                in_specs=[
                    # Pipelined activation tile (compute dtype).
                    pl.BlockSpec((t, d_pad), lambda i: (i, 0)),
                    # Whole-array, single-buffered VMEM residents.
                    pl.BlockSpec(memory_space=pltpu.MemorySpace.VMEM),  # W^T
                    pl.BlockSpec(memory_space=pltpu.MemorySpace.VMEM),  # bias
                ],
                out_specs=pl.BlockSpec((t, d_pad), lambda i: (i, 0)),
            ),
            compiler_params=pltpu.CompilerParams(
                dimension_semantics=("parallel",),
                vmem_limit_bytes=vmem_limit),
            cost_estimate=pl.CostEstimate(
                flops=flops, transcendentals=0,
                bytes_accessed=int(bytes_accessed)),
        )(x2d, wt, b3d)
    else:
        # Streaming fallback (v7x 64 MiB VMEM or very large L*D^2).
        kernel = functools.partial(_streaming_kernel, precision=precision)
        bytes_accessed = (m_pad * d_pad * (cb + 4)
                          + rows * (weight_bytes + bias_bytes))
        out2d = pl.pallas_call(
            kernel,
            out_shape=jax.ShapeDtypeStruct((m_pad, d_pad), seqs.dtype),
            grid_spec=pltpu.PrefetchScalarGridSpec(
                num_scalar_prefetch=0,
                grid=(rows, num_layers),
                in_specs=[
                    # Same x block across the layer axis -> DMA'd once per row tile.
                    pl.BlockSpec((t, d_pad), lambda i, l: (i, 0)),
                    # One layer of weights / bias per step (double-buffered).
                    pl.BlockSpec((1, d_pad, d_pad), lambda i, l: (l, 0, 0)),
                    pl.BlockSpec((1, 1, d_pad), lambda i, l: (l, 0, 0)),
                ],
                out_specs=pl.BlockSpec((t, d_pad), lambda i, l: (i, 0)),
                scratch_shapes=[pltpu.VMEM((t, d_pad), compute_dtype)],
            ),
            compiler_params=pltpu.CompilerParams(
                dimension_semantics=("parallel", "arbitrary"),
                vmem_limit_bytes=vmem_limit),
            cost_estimate=pl.CostEstimate(
                flops=flops, transcendentals=0,
                bytes_accessed=int(bytes_accessed)),
        )(x2d, wt, b3d)

    return out2d[:m, :d].reshape(batch, seq, d)


def energy_projection(seqs, weights, biases, *, tile_m=None,
                      compute_dtype=jnp.bfloat16, force_streaming=False):
    """Convenience wrapper (prefer preparing params once and reusing them)."""
    params = prepare_energy_projection_params(weights, biases,
                                              compute_dtype=compute_dtype)
    return energy_projection_prepared(seqs, params, tile_m=tile_m,
                                      force_streaming=force_streaming)


# --------------------------------------------------------------------------
# Reference + self-test
# --------------------------------------------------------------------------
def _reference(seqs, weights, biases):
    """Pure-JAX fp32 reference matching the PyTorch module semantics."""
    x = seqs
    for l in range(weights.shape[0]):
        x = x @ weights[l].T + biases[l]
        x = jnp.maximum(x, 0.0)
    return x


if __name__ == "__main__":
    batch, seq, model_dim, num_layers = 2, 64, 32, 3

    key = jax.random.PRNGKey(0)
    k_x, k_w, k_b, k_w2, k_b2 = jax.random.split(key, 5)

    seqs = jax.random.normal(k_x, (batch, seq, model_dim), dtype=jnp.float32)

    # Deterministic init mimicking nn.Linear's uniform(-1/sqrt(D), 1/sqrt(D)).
    bound = 1.0 / jnp.sqrt(jnp.float32(model_dim))
    weights = jax.random.uniform(
        k_w, (num_layers, model_dim, model_dim),
        minval=-bound, maxval=bound, dtype=jnp.float32)
    biases = jax.random.uniform(
        k_b, (num_layers, model_dim),
        minval=-bound, maxval=bound, dtype=jnp.float32)

    ref = _reference(seqs, weights, biases)

    # 1) fp32 compute path (precision=HIGHEST): tight check vs reference.
    p_f32 = prepare_energy_projection_params(weights, biases,
                                             compute_dtype=jnp.float32)
    out_f32 = jax.block_until_ready(energy_projection_prepared(seqs, p_f32))
    assert out_f32.shape == (batch, seq, model_dim)
    assert jnp.allclose(out_f32, ref, atol=1e-4, rtol=1e-4), \
        "fp32 mismatch vs reference"

    # 2) Production path: params prepared once, bf16 MXU with fp32 accumulation.
    p_bf16 = prepare_energy_projection_params(weights, biases,
                                              compute_dtype=jnp.bfloat16)
    out_bf16 = jax.block_until_ready(energy_projection_prepared(seqs, p_bf16))
    assert out_bf16.shape == (batch, seq, model_dim)
    assert jnp.allclose(out_bf16, ref, atol=3e-2, rtol=3e-2), \
        "bf16 (resident) mismatch vs reference"

    # 3) Streaming fallback (the path v7x takes for large L*D^2), exercised
    #    here on small shapes for correctness.
    out_stream = jax.block_until_ready(
        energy_projection_prepared(seqs, p_bf16, force_streaming=True))
    assert jnp.allclose(out_stream, ref, atol=3e-2, rtol=3e-2), \
        "bf16 (streaming) mismatch vs reference"

    # 4) Deep stack (exercises the fori_loop liveness-bounded path), fp32.
    weights5 = jax.random.uniform(
        k_w2, (5, model_dim, model_dim),
        minval=-bound, maxval=bound, dtype=jnp.float32)
    biases5 = jax.random.uniform(
        k_b2, (5, model_dim),
        minval=-bound, maxval=bound, dtype=jnp.float32)
    ref5 = _reference(seqs, weights5, biases5)
    p5 = prepare_energy_projection_params(weights5, biases5,
                                          compute_dtype=jnp.float32)
    out5 = jax.block_until_ready(energy_projection_prepared(seqs, p5))
    assert jnp.allclose(out5, ref5, atol=2e-4, rtol=2e-3), \
        "fp32 deep-stack (fori_loop) mismatch vs reference"

    print("KERNEL_OK")
</pallas_src>

<mosaic_0001>
module attributes {stable_mosaic.version = 11 : i64} {
  func.func @_resident_kernel(%arg0: i32, %arg1: memref<64x128xf32, #tpu.memory_space<vmem>>, %arg2: memref<3x128x128xf32, #tpu.memory_space<vmem>>, %arg3: memref<3x1x128xf32, #tpu.memory_space<vmem>>, %arg4: memref<64x128xf32, #tpu.memory_space<vmem>>) attributes {dimension_semantics = [#tpu.dimension_semantics<parallel>], iteration_bounds = array<i64: 2>, scalar_prefetch = 0 : i64, scratch_operands = 0 : i64, tpu.core_type = #tpu.core_type<tc>, window_params = [{transform_indices = @transform_0, window_bounds = array<i64: 64, 128>}, {pipeline_mode = #tpu.pipeline_mode<synchronous>, transform_indices = @transform_1, window_bounds = array<i64: 3, 128, 128>}, {pipeline_mode = #tpu.pipeline_mode<synchronous>, transform_indices = @transform_2, window_bounds = array<i64: 3, 1, 128>}, {transform_indices = @transform_3, window_bounds = array<i64: 64, 128>}]} {
    %c0 = arith.constant 0 : index
    %c0_0 = arith.constant 0 : index
    %0 = vector.load %arg1[%c0, %c0_0] : memref<64x128xf32, #tpu.memory_space<vmem>>, vector<64x128xf32>
    %c0_1 = arith.constant 0 : index
    %c0_2 = arith.constant 0 : index
    %c0_3 = arith.constant 0 : index
    %1 = vector.load %arg2[%c0_1, %c0_2, %c0_3] : memref<3x128x128xf32, #tpu.memory_space<vmem>>, vector<1x128x128xf32>
    %2 = vector.shape_cast %1 : vector<1x128x128xf32> to vector<128x128xf32>
    %cst = arith.constant dense<0.000000e+00> : vector<64x128xf32>
    %3 = tpu.matmul %0, %2, %cst {dimension_numbers = #tpu.dot_dimension_numbers<[1], [0], [0], [1], [0, 0, 1, 1], [], []>, precision = #tpu.contract_precision<fp32>} : vector<64x128xf32>, vector<128x128xf32>, vector<64x128xf32> -> vector<64x128xf32>
    %c0_4 = arith.constant 0 : index
    %c0_5 = arith.constant 0 : index
    %c0_6 = arith.constant 0 : index
    %4 = vector.load %arg3[%c0_4, %c0_5, %c0_6] : memref<3x1x128xf32, #tpu.memory_space<vmem>>, vector<1x1x128xf32>
    %5 = vector.shape_cast %4 : vector<1x1x128xf32> to vector<1x128xf32>
    %6 = vector.broadcast %5 : vector<1x128xf32> to vector<64x128xf32>
    %7 = arith.addf %3, %6 : vector<64x128xf32>
    %cst_7 = arith.constant 0.000000e+00 : f32
    %8 = vector.broadcast %cst_7 : f32 to vector<64x128xf32>
    %9 = arith.maximumf %7, %8 : vector<64x128xf32>
    %c1 = arith.constant 1 : index
    %c0_8 = arith.constant 0 : index
    %c0_9 = arith.constant 0 : index
    %10 = vector.load %arg2[%c1, %c0_8, %c0_9] : memref<3x128x128xf32, #tpu.memory_space<vmem>>, vector<1x128x128xf32>
    %11 = vector.shape_cast %10 : vector<1x128x128xf32> to vector<128x128xf32>
    %cst_10 = arith.constant dense<0.000000e+00> : vector<64x128xf32>
    %12 = tpu.matmul %9, %11, %cst_10 {dimension_numbers = #tpu.dot_dimension_numbers<[1], [0], [0], [1], [0, 0, 1, 1], [], []>, precision = #tpu.contract_precision<fp32>} : vector<64x128xf32>, vector<128x128xf32>, vector<64x128xf32> -> vector<64x128xf32>
    %c1_11 = arith.constant 1 : index
    %c0_12 = arith.constant 0 : index
    %c0_13 = arith.constant 0 : index
    %13 = vector.load %arg3[%c1_11, %c0_12, %c0_13] : memref<3x1x128xf32, #tpu.memory_space<vmem>>, vector<1x1x128xf32>
    %14 = vector.shape_cast %13 : vector<1x1x128xf32> to vector<1x128xf32>
    %15 = vector.broadcast %14 : vector<1x128xf32> to vector<64x128xf32>
    %16 = arith.addf %12, %15 : vector<64x128xf32>
    %cst_14 = arith.constant 0.000000e+00 : f32
    %17 = vector.broadcast %cst_14 : f32 to vector<64x128xf32>
    %18 = arith.maximumf %16, %17 : vector<64x128xf32>
    %c2 = arith.constant 2 : index
    %c0_15 = arith.constant 0 : index
    %c0_16 = arith.constant 0 : index
    %19 = vector.load %arg2[%c2, %c0_15, %c0_16] : memref<3x128x128xf32, #tpu.memory_space<vmem>>, vector<1x128x128xf32>
    %20 = vector.shape_cast %19 : vector<1x128x128xf32> to vector<128x128xf32>
    %cst_17 = arith.constant dense<0.000000e+00> : vector<64x128xf32>
    %21 = tpu.matmul %18, %20, %cst_17 {dimension_numbers = #tpu.dot_dimension_numbers<[1], [0], [0], [1], [0, 0, 1, 1], [], []>, precision = #tpu.contract_precision<fp32>} : vector<64x128xf32>, vector<128x128xf32>, vector<64x128xf32> -> vector<64x128xf32>
    %c2_18 = arith.constant 2 : index
    %c0_19 = arith.constant 0 : index
    %c0_20 = arith.constant 0 : index
    %22 = vector.load %arg3[%c2_18, %c0_19, %c0_20] : memref<3x1x128xf32, #tpu.memory_space<vmem>>, vector<1x1x128xf32>
    %23 = vector.shape_cast %22 : vector<1x1x128xf32> to vector<1x128xf32>
    %24 = vector.broadcast %23 : vector<1x128xf32> to vector<64x128xf32>
    %25 = arith.addf %21, %24 : vector<64x128xf32>
    %cst_21 = arith.constant 0.000000e+00 : f32
    %26 = vector.broadcast %cst_21 : f32 to vector<64x128xf32>
    %27 = arith.maximumf %25, %26 : vector<64x128xf32>
    %c0_22 = arith.constant 0 : index
    %c0_23 = arith.constant 0 : index
    %28 = vector.load %arg4[%c0_22, %c0_23] : memref<64x128xf32, #tpu.memory_space<vmem>>, vector<64x128xf32>
    tpu.vector_store %arg4[%c0_22, %c0_23], %27 {strides = array<i32>} : memref<64x128xf32, #tpu.memory_space<vmem>>, vector<64x128xf32>,
    return
  }
  func.func @transform_0(%arg0: i32) -> (i32, i32) {
    %c0_i32 = arith.constant 0 : i32
    %c0_i32_0 = arith.constant 0 : i32
    return %arg0, %c0_i32 : i32, i32
  }
  func.func @transform_1(%arg0: i32) -> (i32, i32, i32) {
    %c0_i32 = arith.constant 0 : i32
    %c0_i32_0 = arith.constant 0 : i32
    %c0_i32_1 = arith.constant 0 : i32
    %c0_i32_2 = arith.constant 0 : i32
    return %c0_i32, %c0_i32_0, %c0_i32_1 : i32, i32, i32
  }
  func.func @transform_2(%arg0: i32) -> (i32, i32, i32) {
    %c0_i32 = arith.constant 0 : i32
    %c0_i32_0 = arith.constant 0 : i32
    %c0_i32_1 = arith.constant 0 : i32
    %c0_i32_2 = arith.constant 0 : i32
    return %c0_i32, %c0_i32_0, %c0_i32_1 : i32, i32, i32
  }
  func.func @transform_3(%arg0: i32) -> (i32, i32) {
    %c0_i32 = arith.constant 0 : i32
    %c0_i32_0 = arith.constant 0 : i32
    return %arg0, %c0_i32 : i32, i32
  }
}

</mosaic_0001>

<bundles_post_ra>
// kernel: tpu_custom_call.1
= control target key start
LH: loop header
LB: loop body
LE: loop exit
PB: predicated region body
PF: predicated region fallthrough
CT: control target
= control target key end

     0   :  { %8 = vsyncpa [#allocation3], 0  ;;  %s6882_s0 = inlined_call_operand.hbm [shape: f32[128,128], index: 0, kind: input, shape index: {}]   ;;  %s6883_s1 = inlined_call_operand.hbm [shape: f32[3,128,128], index: 1, kind: input, shape index: {}]   ;;  %s6884_s2 = inlined_call_operand.vmem [shape: f32[3,1,128], index: 2, kind: input, shape index: {}]   ;;  %s6885_s3 = inlined_call_operand.hbm [shape: f32[128,128], index: 3, kind: output, shape index: {}]  }
   0x1   :  { %10 = vsyncpa [#allocation3 + $0x1], 0 }
   0x2   :  { %11 = vsyncpa [#allocation6], 0 }
   0x3   :  { %12 = vsyncpa [#allocation4], 0 }
   0x4   :  { %14 = vsyncpa [#allocation4 + $0x1], 0  ;;  %s5427_s12 = smov 0   ;;  %s5429_s13 = smov 0  }
   0x5   :  { %s5431_s14 = smov 0   ;;  %s5433_s15 = smov 0  }
   0x6 LB: > { %s5448_s16 = sadd.s32 4294967295, %s5398_s15   ;;  %s3242_s17 = sadd.s32 4294967294, %s5398_s15   ;;  %s5398_s15 = sphi %s5433_s15, %s7052_s15   ;;  %s5394_s14 = sphi %s5431_s14, %s7051_s14   ;;  %s5390_s13 = sphi %s5429_s13, %s7050_s13   ;;  %s5386_s12 = sphi %s5427_s12, %s7049_s12  }
   0x7   : > { %p40_p0 = scmp.ne.s32.totalorder %s5390_s13, %s5386_s12  ;;  %p6886_p1 = scmp.eq.s32.totalorder %s5448_s16, 0 }
   0x8   : > { %p112_p3 = scmp.eq.s32.totalorder %s3242_s17, 1  ;;  %p3243_p5 = scmp.ge.s32.totalorder %s5398_s15, 1 }
   0x9   : > { %p5457_p4 = por %p6886_p1, %p40_p0  ;;  %p119_p7 = scmp.lt.s32.totalorder %s5398_s15, 3 }
   0xa   : > { %p5462_p6 = por %p112_p3, %p40_p0  ;;  %s5400_s21 = smov [#allocation5]  }
   0xb   : > { %s6955_s18 = scalar_select %p5457_p4, 1, 0 }
   0xc   : > { %s6956_s19 = scalar_select %p5462_p6, 1, 0 }
   0xd   : > { %p5467_p8 = pnand %p3243_p5, %p119_p7  ;;  %s131_s22 = sshll.u32 %s5400_s21, 4  ;;  %s5471_s22 = int_to_ptr.vmem [resolvable:$true] %s131_s22 }
   0xe   : > { %s5483_s24 = sadd.s32 1, %s5398_s15   ;;  %s27_s25 = sadd.s32 1, %s5394_s14 }
   0xf   : > { %s6957_s20 = scalar_select %p5467_p8, 1, 0 }
  0x10   : > { %p5217_p9 = pneg %p5467_p8  ;;  %s24_s26 = ssub.s32 %s5398_s15, %s5483_s24 }
  0x11   : > { %s5270_s29 = scalar_lea.hbm %s6883_s1, 6144 }
  0x12   : > { %p5478_p11 = pnand %p5217_p9, %p6886_p1  ;;  %p5271_p12 = scmp.ne.s32.totalorder %s6883_s1, %s5270_s29 }
  0x13   : > { %p5277_p5 = scmp.lt.u32.totalorder %s5270_s29, %s6883_s1 }
  0x14   : > { %p5272_p13 = pneg %p5478_p11 }
  0x16   : > { %p5273_p0 = pnand %p5272_p13, %p5271_p12 }
  0x18   : > { %p5274_p3 = pneg %p5273_p0 }
  0x1a   : > { %p5279_p7 = pnand %p5277_p5, %p5274_p3 }
  0x1c   : > { %5282 = shalt.err (!%p5279_p7)
}
  0x1d   : > { %s5283_s7 = scalar_lea.vmem %s5471_s22, 6144  ;;  %p5291_p2 = scmp.lt.s32.totalorder %s5471_s22, %s5471_s22 }
  0x1e   : > { %p5284_p9 = scmp.ne.s32.totalorder %s5471_s22, %s5283_s7  ;;  %p5292_p6 = scmp.lt.s32.totalorder %s5283_s7, %s5283_s7 }
  0x20   : > { %p5286_p10 = pnand %p5284_p9, %p5272_p13  ;;  %p5293_p4 = por %p5292_p6, %p5291_p2 }
  0x22   : > { %p5287_p1 = pneg %p5286_p10 }
  0x24   : > { %p5294_p8 = pnand %p5293_p4, %p5287_p1 }
  0x26   : > { %5297 = shalt.err (!%p5294_p8)
}
  0x27   : > { %s5401_s8 = smov 128   ;;  %s5402_s9 = smov 8  }
  0x28   : > { %5220 = dma.hbm_to_vmem [thread:$0]  (!%p5478_p11), %s6883_s1, 6144, %s5471_s22, [#allocation6], %s5401_s8, %s5401_s8, %s5402_s9  }
  0x29   : > { %p25_p1 = scmp.eq.s32.totalorder %s24_s26, 0  ;;  %p34_p2 = scmp.ne.s32.totalorder %s5394_s14, %s5390_s13 }
  0x2a   : > { %p35_p4 = scmp.eq.s32.totalorder %s5398_s15, 0  ;;  %p5230_p6 = scmp.lt.s32.totalorder %s5398_s15, 2 }
  0x2b   : > { %s5517_s17 = scalar_select %p25_p1, %s5394_s14, %s27_s25  }
  0x2c   : > { %p36_p8 = por %p35_p4, %p34_p2  ;;  %p6959_p10 = scmp.eq.s32.totalorder %s5448_s16, 1 }
  0x2d   : > { %s148_s23 = sand.u32 1, %s5394_s14   ;;  %s3263_s27 = sshll.u32 %s5398_s15, 10 }
  0x2e   : > { %p5521_p12 = por %p6959_p10, %p34_p2  ;;  %s3246_s28 = sshll.u32 %s148_s23, 6 }
  0x2f   : > { %s5530_s4 = scalar_lea.hbm %s6882_s0, %s3263_s27  ;;  %s152_s22 = scalar_lea.vmem [#allocation2], %s3246_s28 }
  0x30   : > { %s159_s25 = sshll.u32 %s152_s22, 4  ;;  %p5532_p11 = pnand %p5230_p6, %p36_p8  ;;  %s5536_s25 = int_to_ptr.vmem [resolvable:$true] %s159_s25 }
  0x31   : > { %s5538_s5 = scalar_lea.sflag [#allocation3], %s148_s23  ;;  %s5298_s6 = scalar_lea.hbm %s5530_s4, 1024 }
  0x32   : > { %p5299_p13 = scmp.ne.s32.totalorder %s5530_s4, %s5298_s6  ;;  %p5300_p0 = pneg %p5532_p11 }
  0x33   : > { %s5303_s11 = scalar_lea.hbm %s6882_s0, 2048  ;;  %p5304_p7 = scmp.lt.u32.totalorder %s5530_s4, %s6882_s0 }
  0x34   : > { %p5301_p3 = pnand %p5300_p0, %p5299_p13  ;;  %p5305_p9 = scmp.lt.u32.totalorder %s5303_s11, %s5298_s6 }
  0x35   : > { %p5307_p2 = scmp.lt.u32.totalorder %s5298_s6, %s5530_s4 }
  0x36   : > { %p5302_p5 = pneg %p5301_p3  ;;  %p5306_p1 = por %p5305_p9, %p5304_p7 }
  0x38   : > { %p5308_p4 = por %p5307_p2, %p5306_p1 }
  0x3a   : > { %p5309_p6 = pnand %p5308_p4, %p5302_p5 }
  0x3c   : > { %5312 = shalt.err (!%p5309_p6)
}
  0x3d   : > { %s5313_s23 = scalar_lea.vmem %s5536_s25, 1024  ;;  %s5403_s29 = smov [#allocation2]  }
  0x3e   : > { %p5314_p8 = scmp.ne.s32.totalorder %s5536_s25, %s5313_s23  ;;  %s5318_s30 = sshll.u32 %s5403_s29, 4  ;;  %s5319_s30 = int_to_ptr.vmem [resolvable:$false] %s5318_s30 }
  0x3f   : > { %s5320_s22 = scalar_lea.vmem %s5319_s30, 2048  ;;  %p5321_p3 = scmp.lt.s32.totalorder %s5536_s25, %s5319_s30 }
  0x40   : > { %p5316_p10 = pnand %p5314_p8, %p5300_p0  ;;  %p5322_p7 = scmp.lt.s32.totalorder %s5320_s22, %s5313_s23 }
  0x42   : > { %p5317_p13 = pneg %p5316_p10  ;;  %p5323_p9 = por %p5322_p7, %p5321_p3 }
  0x44   : > { %p5324_p1 = pnand %p5323_p9, %p5317_p13 }
  0x46   : > { %5327 = shalt.err (!%p5324_p1)
}
  0x47   : > { %5224 = dma.hbm_to_vmem [thread:$0]  (!%p5532_p11), %s5530_s4, 1024, %s5536_s25, %s5538_s5, %s5401_s8, %s5401_s8, %s5402_s9  }
  0x48   : > { %p6962_p0 = scmp.ne.s32.totalorder %s6957_s20, 0 }
  0x4a   : > { %171 = sbr.rel (%p6962_p0) target bundleno = 1211 (0x4bb), region = 32 }
  0x51   : > { %s5572_s6 = sand.u32 1, %s5390_s13   ;;  %p6963_p5 = scmp.ne.s32.totalorder %s6955_s18, 0 }
  0x52   : > { %s3250_s7 = sshll.u32 %s5572_s6, 6  ;;  %s174_s10 = scalar_lea.sflag [#allocation3], %s5572_s6 }
  0x53   : > { %s5578_s26 = scalar_lea.vmem [#allocation2], %s3250_s7 }
  0x54   : > { %5373 = dma.done.wait (%p6963_p5), %s174_s10, 1024  }
  0x55   : > { %5375 = vsyncadd (%p6963_p5), %s174_s10, 4294966272  ;;  %p6964_p11 = scmp.eq.s32.totalorder %s5448_s16, 0 }
  0x57   : > { %5377 = dma.done.wait (%p6964_p11), [#allocation6], 6144   ;;  %p6965_p2 = pmov %p6964_p11 }
  0x58   : > { %v214_v0 = vld [vmem:[#allocation5] sm:$0xff]  ;;  %v215_v1 = vld [vmem:[#allocation5 + $0x8] sm:$0xff]  ;;  %v216_v2 = vld [vmem:[#allocation5 + $0x10] sm:$0xff]  ;;  %s203_s5 = scalar_lea.vmem [#allocation7], %s3250_s7  ;;  %s3264_s27 = sshll.u32 %s5448_s16, 10 }
  0x59   : > { %5379 = vsyncadd (%p6965_p2), [#allocation6], 4294961152  ;;  %v238_v3 = vand.u32 4294901760, %v214_v0  ;;  %v241_v4 = vand.u32 4294901760, %v215_v1  ;;  %v217_v5 = vld [vmem:[#allocation5 + $0x18] sm:$0xff]  ;;  %v244_v6 = vand.u32 4294901760, %v216_v2  ;;  %s6838_s29 = scalar_lea.hbm %s6885_s3, %s3264_s27 }
  0x5a   : > { %v5588_v7 = vld [vmem:[#allocation5 + $0x20] sm:$0xff]  ;;  %v5590_v8 = vld [vmem:[#allocation5 + $0x28] sm:$0xff]  ;;  %v247_v9 = vand.u32 4294901760, %v217_v5  ;;  %v5598_v14 = vld [vmem:[#allocation5 + $0x30] sm:$0xff]  ;;  %s3159_s11 = sshll.u32 %s203_s5, 4  ;;  %s3146_s16 = scalar_lea.sflag [#allocation4], %s5572_s6  ;;  %s6833_s11 = int_to_ptr.vmem [resolvable:$true] %s3159_s11 }
  0x5b   : > { %v5592_v10 = vpack.c.bf16 %v241_v4, %v238_v3  ;;  %v250_v11 = vand.u32 4294901760, %v5588_v7  ;;  %v253_v12 = vand.u32 4294901760, %v5590_v8  ;;  %v5600_v15 = vld [vmem:[#allocation5 + $0x38] sm:$0xff]  ;;  %v206_v16 = vld [vmem:[%s5578_s26] sm:$0xff]  ;;  %v256_v19 = vand.u32 4294901760, %v5598_v14  ;;  %v5619_v22 = vld [vmem:[#allocation5 + $0x48] sm:$0xff] }
  0x5c   : > { %v5596_v13 = vpack.c.bf16 %v247_v9, %v244_v6  ;;  %v5607_v17 = vand.u32 4294901760, %v206_v16  ;;  %v259_v20 = vand.u32 4294901760, %v5600_v15  ;;  %v5617_v21 = vld [vmem:[#allocation5 + $0x40] sm:$0xff]  ;;  %v207_v25 = vld [vmem:[%s5578_s26 + $0x8] sm:$0xff]  ;;  %v265_v28 = vand.u32 4294901760, %v5619_v22  ;;  %v5638_v29 = vld [vmem:[#allocation5 + $0x50] sm:$0xff] }
  0x5d   : > { %4490 = vmatprep.subr.bf16.mxu1 %v5592_v10  ;;  %4586 = vmatprep.subr.bf16.mxu0 %v5592_v10  ;;  %v5613_v18 = vpack.c.bf16 %v253_v12, %v250_v11  ;;  %v262_v27 = vand.u32 4294901760, %v5617_v21  ;;  %v5640_v30 = vld [vmem:[#allocation5 + $0x58] sm:$0xff]  ;;  %v5643_v32 = vand.u32 4294901760, %v207_v25  ;;  %v5647_v34 = vsub.f32 %v214_v0, %v238_v3  ;;  %v5659_v38 = vld [vmem:[#allocation5 + $0x60] sm:$0xff]  ;;  %v5661_v39 = vld [vmem:[#allocation5 + $0x68] sm:$0xff]  ;;  %s5328_s30 = scalar_lea.vmem %s6833_s11, 1024 }
  0x5e   : > { %4492 = vmatpush3.bf16.msra.mxu1 %v5592_v10  ;;  %4588 = vmatpush3.bf16.msra.mxu0 %v5592_v10  ;;  %v5622_v23 = vsub.f32 %v206_v16, %v5607_v17  ;;  %v5634_v26 = vpack.c.bf16 %v259_v20, %v256_v19  ;;  %v268_v36 = vand.u32 4294901760, %v5638_v29  ;;  %v271_v37 = vand.u32 4294901760, %v5640_v30  ;;  %v5665_v41 = vld [vmem:[#allocation5 + $0x70] sm:$0xff]  ;;  %v5667_v42 = vld [vmem:[#allocation5 + $0x78] sm:$0xff]  ;;  %v210_v59 = vld [vmem:[%s5578_s26 + $0x20] sm:$0xff]  ;;  %p5329_p4 = scmp.ne.s32.totalorder %s6833_s11, %s5328_s30  ;;  %s5404_s22 = smov [#allocation7]  }
  0x5f   : > { %4494 = vmatprep.subr.bf16.mxu1 %v5596_v13  ;;  %4590 = vmatprep.subr.bf16.mxu0 %v5596_v13  ;;  %v5655_v35 = vpack.c.bf16 %v265_v28, %v262_v27  ;;  %v5663_v40 = vsub.f32 %v215_v1, %v241_v4  ;;  %v5670_v43 = vsub.f32 %v207_v25, %v5643_v32  ;;  %v208_v45 = vld [vmem:[%s5578_s26 + $0x10] sm:$0xff]  ;;  %v6892_v46 = vand.u32 4294901760, %v5659_v38  ;;  %v209_v56 = vld [vmem:[%s5578_s26 + $0x18] sm:$0xff]  ;;  %s5332_s7 = sshll.u32 %s5404_s22, 4  ;;  %s5333_s7 = int_to_ptr.vmem [resolvable:$false] %s5332_s7 }
  0x60   : > { %6966 = vst [vmem:[#allocation11_spill] sm:$0xff] %v5622_v23  ;;  %v320_v24 = vand.u32 4294901760, %v5622_v23  ;;  %v5672_v44 = vsub.f32 %v216_v2, %v244_v6  ;;  %v6891_v47 = vand.u32 4294901760, %v5661_v39  ;;  %v401_v48 = vand.u32 4294901760, %v5647_v34  ;;  %v211_v6 = vld [vmem:[%s5578_s26 + $0x28] sm:$0xff]  ;;  %p5330_p6 = pnand %p5329_p4, %p5521_p12  ;;  %s5334_s10 = scalar_lea.vmem %s5333_s7, 2048 }
  0x61   : > { %6967 = vst [vmem:[#allocation12_spill] sm:$0xff] %v5655_v35  ;;  %v5680_v49 = vsub.f32 %v217_v5, %v247_v9  ;;  %v5688_v50 = vpack.c.bf16 %v271_v37, %v268_v36  ;;  %v408_v51 = vand.u32 4294901760, %v5663_v40  ;;  %v5692_v52 = vsub.f32 %v5588_v7, %v250_v11  ;;  %p5335_p10 = scmp.lt.s32.totalorder %s6833_s11, %s5333_s7  ;;  %p5336_p13 = scmp.lt.s32.totalorder %s5334_s10, %s5328_s30 }
  0x62   : > { %4496 = vmatpush3.bf16.msra.mxu1 %v5596_v13  ;;  %4592 = vmatpush3.bf16.msra.mxu0 %v5596_v13  ;;  %v321_v31 = vsub.f32 %v5622_v23, %v320_v24  ;;  %v6890_v53 = vand.u32 4294901760, %v5665_v41  ;;  %v6889_v54 = vand.u32 4294901760, %v5667_v42  ;;  %v5696_v55 = vand.u32 4294901760, %v208_v45  ;;  %p5331_p8 = pneg %p5330_p6 }
  0x63   : > { %4498 = vmatprep.subr.bf16.mxu1 %v5613_v18  ;;  %4594 = vmatprep.subr.bf16.mxu0 %v5613_v18  ;;  %6968 = vst [vmem:[#allocation13_spill] sm:$0xff] %v5688_v50  ;;  %v6893_v57 = vand.u32 4294901760, %v5670_v43  ;;  %v415_v58 = vand.u32 4294901760, %v5672_v44  ;;  %v5708_v60 = vpack.c.bf16 %v6891_v47, %v6892_v46  ;;  %v402_v61 = vsub.f32 %v5647_v34, %v401_v48  ;;  %p5337_p3 = por %p5336_p13, %p5335_p10 }
  0x64   : > { %3861 = vmatprep.mubr.f32.mxu0 %v320_v24  ;;  %v322_v33 = vand.u32 4294901760, %v321_v31  ;;  %v422_v62 = vand.u32 4294901760, %v5680_v49  ;;  %v409_v63 = vsub.f32 %v5663_v40, %v408_v51  ;;  %v6894_v0 = vand.u32 4294901760, %v5692_v52 }
  0x65   : > { %6969 = vst [vmem:[#allocation14_spill] sm:$0xff] %v5708_v60  ;;  %v5719_v1 = vsub.f32 %v5590_v8, %v253_v12  ;;  %v5721_v2 = vand.u32 4294901760, %v209_v56  ;;  %v5727_v3 = vpack.c.bf16 %v6889_v54, %v6890_v53  ;;  %v5730_v4 = vsub.f32 %v208_v45, %v5696_v55  ;;  %v212_v12 = vld [vmem:[%s5578_s26 + $0x30] sm:$0xff]  ;;  %p5338_p7 = pnand %p5337_p3, %p5331_p8 }
  0x66   : > { %4500 = vmatpush3.bf16.msra.mxu1 %v5613_v18  ;;  %4596 = vmatpush3.bf16.msra.mxu0 %v5613_v18  ;;  %v5732_v5 = vand.u32 4294901760, %v210_v59  ;;  %v5735_v7 = vpack.c.bf16 %v408_v51, %v401_v48  ;;  %v331_v8 = vsub.f32 %v5670_v43, %v6893_v57  ;;  %v416_v9 = vsub.f32 %v5672_v44, %v415_v58 }
  0x67   : > { %4502 = vmatprep.subr.bf16.mxu1 %v5634_v26  ;;  %4598 = vmatprep.subr.bf16.mxu0 %v5634_v26  ;;  %6970 = vst [vmem:[#allocation15_spill] sm:$0xff] %v5727_v3  ;;  %6971 = vst [vmem:[#allocation16_spill] sm:$0xff] %v5730_v4  ;;  %v5744_v11 = vsub.f32 %v5598_v14, %v256_v19  ;;  %v403_v16 = vand.u32 4294901760, %v402_v61  ;;  %v423_v24 = vsub.f32 %v5680_v49, %v422_v62 }
  0x68   : > { %3729 = vmatprep.mubr.f32.mxu1 %v322_v33  ;;  %v5753_v25 = vsub.f32 %v5600_v15, %v259_v20  ;;  %v5756_v31 = vsub.f32 %v209_v56, %v5721_v2  ;;  %v410_v14 = vand.u32 4294901760, %v409_v63  ;;  %v5763_v19 = vsub.f32 %v5692_v52, %v6894_v0 }
  0x69   : > { %v436_v33 = vand.u32 4294901760, %v5719_v1  ;;  %v5766_v45 = vand.u32 4294901760, %v211_v6  ;;  %v5771_v15 = vsub.f32 %v5617_v21, %v262_v27  ;;  %v340_v20 = vand.u32 4294901760, %v5730_v4 }
  0x6a   : > { %4504 = vmatpush3.bf16.msra.mxu1 %v5634_v26  ;;  %4600 = vmatpush3.bf16.msra.mxu0 %v5634_v26  ;;  %6972 = vst [vmem:[#allocation17_spill] sm:$0xff] %v5756_v31  ;;  %v5775_v48 = vsub.f32 %v210_v59, %v5732_v5  ;;  %v5777_v51 = vand.u32 4294901760, %v212_v12  ;;  %v5779_v56 = vpack.c.bf16 %v422_v62, %v415_v58  ;;  %v443_v61 = vand.u32 4294901760, %v5744_v11  ;;  %v213_v62 = vld [vmem:[%s5578_s26 + $0x38] sm:$0xff] }
  0x6b   : > { %4506 = vmatprep.subr.bf16.mxu1 %v5655_v35  ;;  %4602 = vmatprep.subr.bf16.mxu0 %v5655_v35  ;;  %v350_v63 = vand.u32 4294901760, %v5756_v31  ;;  %v5784_v54 = vsub.f32 %v211_v6, %v5766_v45  ;;  %v332_v21 = vand.u32 4294901760, %v331_v8  ;;  %v417_v27 = vand.u32 4294901760, %v416_v9 }
  0x6c   : > { %6973 = vst [vmem:[#allocation18_spill] sm:$0xff] %v5775_v48  ;;  %v450_v59 = vand.u32 4294901760, %v5753_v25  ;;  %v5792_v58 = vsub.f32 %v5619_v22, %v265_v28  ;;  %v4521_v6 = vpack.c.bf16 %v410_v14, %v403_v16  ;;  %v424_v53 = vand.u32 4294901760, %v423_v24 }
  0x6d   : > { %6974 = vst [vmem:[#allocation19_spill] sm:$0xff] %v5784_v54  ;;  %v431_v47 = vand.u32 4294901760, %v5763_v19  ;;  %v437_v46 = vsub.f32 %v5719_v1, %v436_v33  ;;  %v341_v9 = vsub.f32 %v5730_v4, %v340_v20  ;;  %v360_v57 = vand.u32 4294901760, %v5775_v48 }
  0x6e   : > { %4508 = vmatpush3.bf16.msra.mxu1 %v5655_v35  ;;  %4604 = vmatpush3.bf16.msra.mxu0 %v5655_v35  ;;  %v5803_v22 = vsub.f32 %v212_v12, %v5777_v51  ;;  %v444_v28 = vsub.f32 %v5744_v11, %v443_v61  ;;  %v351_v0 = vsub.f32 %v5756_v31, %v350_v63  ;;  %v370_v16 = vand.u32 4294901760, %v5784_v54 }
  0x6f   : > { %4510 = vmatprep.subr.bf16.mxu1 %v5688_v50  ;;  %4606 = vmatprep.subr.bf16.mxu0 %v5688_v50  ;;  %v5808_v24 = vand.u32 4294901760, %v213_v62  ;;  %v451_v14 = vsub.f32 %v5753_v25, %v450_v59  ;;  %v464_v19 = vand.u32 4294901760, %v5792_v58  ;;  %v5817_v12 = vsub.f32 %v5638_v29, %v268_v36 }
  0x70   : > { %v5822_v8 = vsub.f32 %v5640_v30, %v271_v37  ;;  %v4525_v31 = vpack.c.bf16 %v424_v53, %v417_v27  ;;  %v438_v4 = vand.u32 4294901760, %v437_v46  ;;  %v6976_v23 = vand.u32 4294901760, %v5771_v15 }
  0x71   : > { %v342_v36 = vand.u32 4294901760, %v341_v9  ;;  %v361_v35 = vsub.f32 %v5775_v48, %v360_v57  ;;  %v380_v30 = vand.u32 4294901760, %v5803_v22  ;;  %v6977_v37 = vand.u32 4294901760, %v5670_v43 }
  0x72   : > { %4512 = vmatpush3.bf16.msra.mxu1 %v5688_v50  ;;  %4608 = vmatpush3.bf16.msra.mxu0 %v5688_v50  ;;  %v5828_v50 = vsub.f32 %v213_v62, %v5808_v24  ;;  %v458_v29 = vsub.f32 %v5771_v15, %v6976_v23  ;;  %v445_v46 = vand.u32 4294901760, %v444_v28  ;;  %v352_v53 = vand.u32 4294901760, %v351_v0 }
  0x73   : > { %4514 = vmatprep.subr.bf16.mxu1 %v5708_v60  ;;  %4610 = vmatprep.subr.bf16.mxu0 %v5708_v60  ;;  %v452_v27 = vand.u32 4294901760, %v451_v14  ;;  %v465_v23 = vsub.f32 %v5792_v58, %v464_v19  ;;  %v471_v62 = vand.u32 4294901760, %v5817_v12  ;;  %v478_v9 = vand.u32 4294901760, %v5822_v8 }
  0x74   : > { %v6978_v0 = vand.u32 4294901760, %v5659_v38  ;;  %v362_v14 = vand.u32 4294901760, %v361_v35  ;;  %v459_v48 = vand.u32 4294901760, %v458_v29 }
  0x76   : > { %4516 = vmatpush3.bf16.msra.mxu1 %v5708_v60  ;;  %4612 = vmatpush3.bf16.msra.mxu0 %v5708_v60  ;;  %v5847_v28 = vsub.f32 %v5659_v38, %v6978_v0  ;;  %v4533_v38 = vpack.c.bf16 %v452_v27, %v445_v46  ;;  %v466_v0 = vand.u32 4294901760, %v465_v23 }
  0x77   : > { %4518 = vmatprep.subr.bf16.mxu1 %v5727_v3  ;;  %4614 = vmatprep.subr.bf16.mxu0 %v5727_v3 }
  0x78   : > { %v485_v35 = vand.u32 4294901760, %v5847_v28  ;;  %v4537_v46 = vpack.c.bf16 %v466_v0, %v459_v48  ;;  %v4637_v48 = vpack.c.bf16 %v478_v9, %v471_v62  ;;  %v5946_v0 = vld [vmem:[#allocation5 + $0xa0] sm:$0xff] }
  0x7a   : > { %4520 = vmatpush3.bf16.msra.mxu1 %v5727_v3  ;;  %4616 = vmatpush3.bf16.msra.mxu0 %v5727_v3  ;;  %v6975_v3 = vand.u32 4294901760, %v5692_v52  ;;  %v486_v23 = vsub.f32 %v5847_v28, %v485_v35 }
  0x7b   : > { %4522 = vmatprep.subr.bf16.mxu1 %v4521_v6  ;;  %4618 = vmatprep.subr.bf16.mxu0 %v5735_v7 }
  0x7c   : > { %v4625_v60 = vpack.c.bf16 %v436_v33, %v6975_v3  ;;  %v371_v3 = vsub.f32 %v5784_v54, %v370_v16  ;;  %v390_v33 = vand.u32 4294901760, %v5828_v50  ;;  %v4629_v54 = vpack.c.bf16 %v450_v59, %v443_v61 }
  0x7d   : > { %3730 = vmatmul.mubr.f32.vlgmr.msra.gmra.mrb[0].mxu1 %v332_v21  ;;  %3862 = vmatmul.mubr.f32.vlgmr.msra.gmra.mrb[0].mxu0 %v6977_v37  ;;  %v4529_v21 = vpack.c.bf16 %v438_v4, %v431_v47  ;;  %v381_v37 = vsub.f32 %v5803_v22, %v380_v30  ;;  %v6980_v61 = vand.u32 4294901760, %v5665_v41 }
  0x7e   : > { %4524 = vmatpush3.bf16.msra.mxu1 %v4521_v6  ;;  %4620 = vmatpush3.bf16.msra.mxu0 %v5735_v7  ;;  %v6979_v6 = vand.u32 4294901760, %v5661_v39  ;;  %v372_v47 = vand.u32 4294901760, %v371_v3  ;;  %v391_v4 = vsub.f32 %v5828_v50, %v390_v33 }
  0x7f   : > { %4526 = vmatprep.subr.bf16.mxu1 %v4525_v31  ;;  %4622 = vmatprep.subr.bf16.mxu0 %v5779_v56  ;;  %v382_v59 = vand.u32 4294901760, %v381_v37 }
  0x80   : > { %v5852_v7 = vsub.f32 %v5661_v39, %v6979_v6  ;;  %3732 = vmatprep.mubr.f32.mxu1 %v342_v36  ;;  %3864 = vmatprep.mubr.f32.mxu0 %v340_v20  ;;  %v472_v39 = vsub.f32 %v5817_v12, %v471_v62  ;;  %v479_v36 = vsub.f32 %v5822_v8, %v478_v9  ;;  %v392_v29 = vand.u32 4294901760, %v391_v4 }
  0x81   : > { %3733 = vmatmul.mubr.f32.gmra.mrb[2].mxu1 %v352_v53  ;;  %3865 = vmatmul.mubr.f32.gmra.mrb[2].mxu0 %v350_v63  ;;  %v5864_v63 = vsub.f32 %v5665_v41, %v6980_v61  ;;  %v6982_v53 = vand.u32 4294901760, %v5771_v15  ;;  %v4557_v4 = vpack.c.bf16 %v5680_v49, %v5672_v44  ;;  %v6984_v44 = vld [vmem:[#allocation11_spill] sm:$0xff]  ;;  %v6985_v49 = vld [vmem:[#allocation13_spill] sm:$0xff] }
  0x82   : > { %4528 = vmatpush3.bf16.msra.mxu1 %v4525_v31  ;;  %4624 = vmatpush3.bf16.msra.mxu0 %v5779_v56  ;;  %v492_v20 = vand.u32 4294901760, %v5852_v7  ;;  %v6981_v31 = vand.u32 4294901760, %v5667_v42  ;;  %v473_v27 = vand.u32 4294901760, %v472_v39  ;;  %v480_v41 = vand.u32 4294901760, %v479_v36  ;;  %v5948_v39 = vld [vmem:[#allocation5 + $0xa8] sm:$0xff]  ;;  %v5962_v61 = vld [vmem:[#allocation5 + $0xb0] sm:$0xff] }
  0x83   : > { %4530 = vmatprep.subr.bf16.mxu1 %v4529_v21  ;;  %4626 = vmatprep.subr.bf16.mxu0 %v4625_v60  ;;  %v4633_v3 = vpack.c.bf16 %v464_v19, %v6982_v53 }
  0x84   : > { %v5869_v56 = vsub.f32 %v5667_v42, %v6981_v31  ;;  %3735 = vmatprep.mubr.f32.mxu1 %v362_v14  ;;  %3867 = vmatprep.mubr.f32.mxu0 %v360_v57  ;;  %v493_v42 = vsub.f32 %v5852_v7, %v492_v20  ;;  %v499_v57 = vand.u32 4294901760, %v5864_v63  ;;  %v6988_v31 = vld [vmem:[#allocation16_spill] sm:$0xff] }
  0x85   : > { %3736 = vmatmul.mubr.f32.gmra.mrb[4].mxu1 %v372_v47  ;;  %3868 = vmatmul.mubr.f32.gmra.mrb[4].mxu0 %v370_v16  ;;  %v487_v16 = vand.u32 4294901760, %v486_v23  ;;  %v4553_v47 = vpack.c.bf16 %v5663_v40, %v5647_v34  ;;  %v4561_v34 = vpack.c.bf16 %v5719_v1, %v5692_v52  ;;  %v6983_v40 = vld [vmem:[#allocation12_spill] sm:$0xff]  ;;  %v4577_v52 = vpack.c.bf16 %v5852_v7, %v5847_v28 }
  0x86   : > { %4532 = vmatpush3.bf16.msra.mxu1 %v4529_v21  ;;  %4628 = vmatpush3.bf16.msra.mxu0 %v4625_v60  ;;  %v506_v6 = vand.u32 4294901760, %v5869_v56  ;;  %v4541_v60 = vpack.c.bf16 %v480_v41, %v473_v27  ;;  %v494_v19 = vand.u32 4294901760, %v493_v42  ;;  %v500_v21 = vsub.f32 %v5864_v63, %v499_v57  ;;  %v5924_v1 = vld [vmem:[#allocation5 + $0x88] sm:$0xff] }
  0x87   : > { %4534 = vmatprep.subr.bf16.mxu1 %v4533_v38  ;;  %4630 = vmatprep.subr.bf16.mxu0 %v4629_v54 }
  0x88   : > { %3738 = vmatprep.mubr.f32.mxu1 %v382_v59  ;;  %3870 = vmatprep.mubr.f32.mxu0 %v380_v30  ;;  %v507_v14 = vsub.f32 %v5869_v56, %v506_v6  ;;  %v4545_v30 = vpack.c.bf16 %v494_v19, %v487_v16  ;;  %v4645_v37 = vpack.c.bf16 %v506_v6, %v499_v57  ;;  %v6989_v59 = vld [vmem:[#allocation17_spill] sm:$0xff]  ;;  %v1203_v19 = vld [vmem:[#allocation5 + $0xf8] sm:$0xff] }
  0x89   : > { %3739 = vmatmul.mubr.f32.gmra.mrb[6].mxu1 %v392_v29  ;;  %3871 = vmatmul.mubr.f32.gmra.mrb[6].mxu0 %v390_v33  ;;  %v501_v33 = vand.u32 4294901760, %v500_v21  ;;  %v6990_v29 = vld [vmem:[#allocation18_spill] sm:$0xff]  ;;  %v1202_v16 = vld [vmem:[#allocation5 + $0xf0] sm:$0xff] }
  0x8a   : > { %4536 = vmatpush3.bf16.msra.mxu1 %v4533_v38  ;;  %4632 = vmatpush3.bf16.msra.mxu0 %v4629_v54  ;;  %v4641_v54 = vpack.c.bf16 %v492_v20, %v485_v35  ;;  %v508_v62 = vand.u32 4294901760, %v507_v14  ;;  %v1225_v35 = vand.u32 4294901760, %v5946_v0  ;;  %v1228_v20 = vand.u32 4294901760, %v5948_v39 }
  0x8b   : > { %4538 = vmatprep.subr.bf16.mxu1 %v4537_v46  ;;  %4634 = vmatprep.subr.bf16.mxu0 %v4633_v3  ;;  %v1255_v21 = vand.u32 4294901760, %v1202_v16  ;;  %v1258_v14 = vand.u32 4294901760, %v1203_v19 }
  0x8c   : > { %3773 = vmatprep.mubr.f32.mxu1 %v5607_v17  ;;  %3905 = vmatprep.mubr.f32.mxu0 %v5607_v17  ;;  %v4549_v9 = vpack.c.bf16 %v508_v62, %v501_v33 }
  0x8d   : > { %v6023_v33 = vpack.c.bf16 %v1258_v14, %v1255_v21 }
  0x8e   : > { %4540 = vmatpush3.bf16.msra.mxu1 %v4537_v46  ;;  %4636 = vmatpush3.bf16.msra.mxu0 %v4633_v3  ;;  %v6991_v46 = vld [vmem:[#allocation19_spill] sm:$0xff] }
  0x8f   : > { %4542 = vmatprep.subr.bf16.mxu1 %v4541_v60  ;;  %4638 = vmatprep.subr.bf16.mxu0 %v4637_v48 }
  0x92   : > { %4544 = vmatpush3.bf16.msra.mxu1 %v4541_v60  ;;  %4640 = vmatpush3.bf16.msra.mxu0 %v4637_v48 }
  0x93   : > { %4546 = vmatprep.subr.bf16.mxu1 %v4545_v30  ;;  %4642 = vmatprep.subr.bf16.mxu0 %v4641_v54 }
  0x96   : > { %4548 = vmatpush3.bf16.msra.mxu1 %v4545_v30  ;;  %4644 = vmatpush3.bf16.msra.mxu0 %v4641_v54 }
  0x97   : > { %4550 = vmatprep.subr.bf16.mxu1 %v4549_v9  ;;  %4646 = vmatprep.subr.bf16.mxu0 %v4645_v37 }
  0x9a   : > { %4552 = vmatpush3.bf16.msra.mxu1 %v4549_v9  ;;  %4648 = vmatpush3.bf16.msra.mxu0 %v4645_v37 }
  0x9b   : > { %4554 = vmatprep.subr.bf16.mxu1 %v4553_v47  ;;  %4650 = vmatprep.subr.bf16.mxu0 %v5592_v10 }
  0x9d   : > { %3774 = vmatmul.mubr.f32.vlgmr.msra.gmra.mrb[0].mxu1 %v5643_v32  ;;  %3906 = vmatmul.mubr.f32.vlgmr.msra.gmra.mrb[0].mxu0 %v5643_v32 }
  0x9e   : > { %4556 = vmatpush3.bf16.msra.mxu1 %v4553_v47  ;;  %4652 = vmatpush3.bf16.msra.mxu0 %v5592_v10  ;;  %v4565_v10 = vpack.c.bf16 %v5753_v25, %v5744_v11  ;;  %v6986_v11 = vld [vmem:[#allocation14_spill] sm:$0xff] }
  0x9f   : > { %4558 = vmatprep.subr.bf16.mxu1 %v4557_v4  ;;  %4654 = vmatprep.subr.bf16.mxu0 %v5596_v13 }
  0xa0   : > { %3776 = vmatprep.mubr.f32.mxu1 %v5696_v55  ;;  %3908 = vmatprep.mubr.f32.mxu0 %v5696_v55 }
  0xa1   : > { %3777 = vmatmul.mubr.f32.gmra.mrb[2].mxu1 %v5721_v2  ;;  %3909 = vmatmul.mubr.f32.gmra.mrb[2].mxu0 %v5721_v2 }
  0xa2   : > { %4560 = vmatpush3.bf16.msra.mxu1 %v4557_v4  ;;  %4656 = vmatpush3.bf16.msra.mxu0 %v5596_v13  ;;  %v4569_v13 = vpack.c.bf16 %v5792_v58, %v5771_v15  ;;  %v1216_v15 = vand.u32 4294901760, %v5924_v1  ;;  %v5932_v58 = vld [vmem:[#allocation5 + $0x90] sm:$0xff] }
  0xa3   : > { %4562 = vmatprep.subr.bf16.mxu1 %v4561_v34  ;;  %4658 = vmatprep.subr.bf16.mxu0 %v5613_v18  ;;  %v1219_v7 = vand.u32 4294901760, %v5932_v58 }
  0xa4   : > { %3779 = vmatprep.mubr.f32.mxu1 %v5732_v5  ;;  %3911 = vmatprep.mubr.f32.mxu0 %v5732_v5  ;;  %v6017_v48 = vsub.f32 %v5924_v1, %v1216_v15 }
  0xa5   : > { %3780 = vmatmul.mubr.f32.gmra.mrb[4].mxu1 %v5766_v45  ;;  %3912 = vmatmul.mubr.f32.gmra.mrb[4].mxu0 %v5766_v45 }
  0xa6   : > { %4564 = vmatpush3.bf16.msra.mxu1 %v4561_v34  ;;  %4660 = vmatpush3.bf16.msra.mxu0 %v5613_v18  ;;  %v4573_v18 = vpack.c.bf16 %v5822_v8, %v5817_v12  ;;  %v5934_v8 = vld [vmem:[#allocation5 + $0x98] sm:$0xff]  ;;  %v6987_v12 = vld [vmem:[#allocation15_spill] sm:$0xff]  ;;  %v6920_v54 = vand.u32 4294901760, %v6017_v48 }
  0xa7   : > { %4566 = vmatprep.subr.bf16.mxu1 %v4565_v10  ;;  %4662 = vmatprep.subr.bf16.mxu0 %v5634_v26  ;;  %v1222_v38 = vand.u32 4294901760, %v5934_v8 }
  0xa8   : > { %3782 = vmatprep.mubr.f32.mxu1 %v5777_v51  ;;  %3914 = vmatprep.mubr.f32.mxu0 %v5777_v51  ;;  %v1384_v9 = vsub.f32 %v6017_v48, %v6920_v54 }
  0xa9   : > { %3783 = vmatmul.mubr.f32.gmra.mrb[6].mxu1 %v5808_v24  ;;  %3915 = vmatmul.mubr.f32.gmra.mrb[6].mxu0 %v5808_v24  ;;  %v5956_v36 = vpack.c.bf16 %v1222_v38, %v1219_v7 }
  0xaa   : > { %4568 = vmatpush3.bf16.msra.mxu1 %v4565_v10  ;;  %4664 = vmatpush3.bf16.msra.mxu0 %v5634_v26  ;;  %v5922_v26 = vld [vmem:[#allocation5 + $0x80] sm:$0xff]  ;;  %v1385_v47 = vand.u32 4294901760, %v1384_v9 }
  0xab   : > { %4570 = vmatprep.subr.bf16.mxu1 %v4569_v13  ;;  %4666 = vmatprep.subr.bf16.mxu0 %v6983_v40  ;;  %v1213_v25 = vand.u32 4294901760, %v5922_v26 }
  0xac   : > { %3817 = vmatprep.mubr.f32.mxu1 %v6984_v44  ;;  %3949 = vmatprep.mubr.f32.mxu0 %v5607_v17  ;;  %v4581_v17 = vpack.c.bf16 %v5869_v56, %v5864_v63  ;;  %v5964_v63 = vld [vmem:[#allocation5 + $0xb8] sm:$0xff]  ;;  %v5974_v56 = vpack.c.bf16 %v1228_v20, %v1225_v35 }
  0xad   : > { %v5942_v28 = vpack.c.bf16 %v1216_v15, %v1213_v25  ;;  %v6012_v60 = vsub.f32 %v5922_v26, %v1213_v25 }
  0xae   : > { %4572 = vmatpush3.bf16.msra.mxu1 %v4569_v13  ;;  %4668 = vmatpush3.bf16.msra.mxu0 %v6983_v40 }
  0xaf   : > { %4574 = vmatprep.subr.bf16.mxu1 %v4573_v18  ;;  %4670 = vmatprep.subr.bf16.mxu0 %v6985_v49  ;;  %v6921_v30 = vand.u32 4294901760, %v6012_v60  ;;  %v6094_v9 = vpack.c.bf16 %v6017_v48, %v6012_v60 }
  0xb1   : > { %v1377_v62 = vsub.f32 %v6012_v60, %v6921_v30 }
  0xb2   : > { %4576 = vmatpush3.bf16.msra.mxu1 %v4573_v18  ;;  %4672 = vmatpush3.bf16.msra.mxu0 %v6985_v49 }
  0xb3   : > { %4578 = vmatprep.subr.bf16.mxu1 %v4577_v52  ;;  %4674 = vmatprep.subr.bf16.mxu0 %v6986_v11  ;;  %v1378_v37 = vand.u32 4294901760, %v1377_v62 }
  0xb5   : > { %v6033_v4 = vpack.c.bf16 %v1385_v47, %v1378_v37 }
  0xb6   : > { %4580 = vmatpush3.bf16.msra.mxu1 %v4577_v52  ;;  %4676 = vmatpush3.bf16.msra.mxu0 %v6986_v11 }
  0xb7   : > { %4582 = vmatprep.subr.bf16.mxu1 %v4581_v17  ;;  %4678 = vmatprep.subr.bf16.mxu0 %v6987_v12 }
  0xba   : > { %4584 = vmatpush3.bf16.msra.mxu1 %v4581_v17  ;;  %4680 = vmatpush3.bf16.msra.mxu0 %v6987_v12 }
  0xbb   : > { %4682 = vmatprep.subr.bf16.mxu1 %v5942_v28 }
  0xbd   : > { %3818 = vmatmul.mubr.f32.vlgmr.msra.gmra.mrb[0].mxu1 %v5670_v43  ;;  %3950 = vmatmul.mubr.f32.vlgmr.msra.gmra.mrb[0].mxu0 %v5643_v32  ;;  %v1231_v32 = vand.u32 4294901760, %v5962_v61  ;;  %v1234_v43 = vand.u32 4294901760, %v5964_v63 }
  0xbe   : > { %3820 = vmatprep.mubr.f32.mxu1 %v6988_v31  ;;  %3952 = vmatprep.mubr.f32.mxu0 %v5696_v55 }
  0xbf   : > { %4684 = vmatpush3.bf16.msra.mxu1 %v5942_v28  ;;  %v5988_v55 = vpack.c.bf16 %v1234_v43, %v1231_v32 }
  0xc0   : > { %4686 = vmatprep.subr.bf16.mxu1 %v5956_v36 }
  0xc1   : > { %3821 = vmatmul.mubr.f32.gmra.mrb[2].mxu1 %v6989_v59  ;;  %3953 = vmatmul.mubr.f32.gmra.mrb[2].mxu0 %v5721_v2  ;;  %v1196_v2 = vld [vmem:[#allocation5 + $0xc0] sm:$0xff] }
  0xc2   : > { %3823 = vmatprep.mubr.f32.mxu1 %v6990_v29  ;;  %3955 = vmatprep.mubr.f32.mxu0 %v5732_v5  ;;  %v1197_v5 = vld [vmem:[#allocation5 + $0xc8] sm:$0xff]  ;;  %v1237_v53 = vand.u32 4294901760, %v1196_v2 }
  0xc3   : > { %4688 = vmatpush3.bf16.msra.mxu1 %v5956_v36  ;;  %v1240_v3 = vand.u32 4294901760, %v1197_v5 }
  0xc4   : > { %4690 = vmatprep.subr.bf16.mxu1 %v5974_v56  ;;  %v6036_v34 = vsub.f32 %v1196_v2, %v1237_v53 }
  0xc5   : > { %3824 = vmatmul.mubr.f32.gmra.mrb[4].mxu1 %v6991_v46  ;;  %3956 = vmatmul.mubr.f32.gmra.mrb[4].mxu0 %v5766_v45  ;;  %v5999_v27 = vpack.c.bf16 %v1240_v3, %v1237_v53  ;;  %v1198_v45 = vld [vmem:[#allocation5 + $0xd0] sm:$0xff]  ;;  %v6038_v10 = vsub.f32 %v1197_v5, %v1240_v3 }
  0xc6   : > { %3826 = vmatprep.mubr.f32.mxu1 %v5803_v22  ;;  %3958 = vmatprep.mubr.f32.mxu0 %v5777_v51  ;;  %v1199_v22 = vld [vmem:[#allocation5 + $0xd8] sm:$0xff]  ;;  %v1243_v51 = vand.u32 4294901760, %v1198_v45  ;;  %v6915_v13 = vand.u32 4294901760, %v6036_v34 }
  0xc7   : > { %4692 = vmatpush3.bf16.msra.mxu1 %v5974_v56  ;;  %v1246_v41 = vand.u32 4294901760, %v1199_v22  ;;  %v6914_v40 = vand.u32 4294901760, %v6038_v10  ;;  %v6098_v37 = vpack.c.bf16 %v6038_v10, %v6036_v34 }
  0xc8   : > { %4694 = vmatprep.subr.bf16.mxu1 %v5988_v55  ;;  %v1433_v18 = vsub.f32 %v6036_v34, %v6915_v13  ;;  %v6048_v49 = vsub.f32 %v1198_v45, %v1243_v51  ;;  %v6073_v45 = vsub.f32 %v1202_v16, %v1255_v21 }
  0xc9   : > { %3827 = vmatmul.mubr.f32.gmra.mrb[6].mxu1 %v5828_v50  ;;  %3959 = vmatmul.mubr.f32.gmra.mrb[6].mxu0 %v5808_v24  ;;  %v6003_v23 = vpack.c.bf16 %v1246_v41, %v1243_v51  ;;  %v1200_v50 = vld [vmem:[#allocation5 + $0xe0] sm:$0xff]  ;;  %v1201_v24 = vld [vmem:[#allocation5 + $0xe8] sm:$0xff]  ;;  %v1440_v44 = vsub.f32 %v6038_v10, %v6914_v40  ;;  %v6050_v52 = vsub.f32 %v1199_v22, %v1246_v41 }
  0xca   : > { %v1249_v42 = vand.u32 4294901760, %v1200_v50  ;;  %v1252_v57 = vand.u32 4294901760, %v1201_v24  ;;  %v1434_v26 = vand.u32 4294901760, %v1433_v18  ;;  %v6913_v11 = vand.u32 4294901760, %v6048_v49  ;;  %6993 = vst [vmem:[#allocation11_spill] sm:$0xff] %v6073_v45 }
  0xcb   : > { %4696 = vmatpush3.bf16.msra.mxu1 %v5988_v55  ;;  %v1441_v1 = vand.u32 4294901760, %v1440_v44  ;;  %v6912_v17 = vand.u32 4294901760, %v6050_v52  ;;  %v6075_v22 = vsub.f32 %v1203_v19, %v1258_v14  ;;  %v6102_v47 = vpack.c.bf16 %v6050_v52, %v6048_v49 }
  0xcc   : > { %4698 = vmatprep.subr.bf16.mxu1 %v5999_v27  ;;  %v6007_v6 = vpack.c.bf16 %v1252_v57, %v1249_v42  ;;  %v1447_v15 = vsub.f32 %v6048_v49, %v6913_v11  ;;  %v6062_v31 = vsub.f32 %v1200_v50, %v1249_v42  ;;  %v6064_v59 = vsub.f32 %v1201_v24, %v1252_v57 }
  0xcd   : > { %v6054_v25 = vpack.c.bf16 %v1441_v1, %v1434_v26  ;;  %v1454_v12 = vsub.f32 %v6050_v52, %v6912_v17  ;;  %6994 = vst [vmem:[#allocation13_spill] sm:$0xff] %v6075_v22  ;;  %v6909_v50 = vand.u32 4294901760, %v6073_v45  ;;  %v6908_v24 = vand.u32 4294901760, %v6075_v22 }
  0xce   : > { %6992 = vst [vmem:[#allocation12_spill] sm:$0xff] %v6064_v59  ;;  %v1448_v29 = vand.u32 4294901760, %v1447_v15  ;;  %v6911_v2 = vand.u32 4294901760, %v6062_v31  ;;  %v6910_v5 = vand.u32 4294901760, %v6064_v59  ;;  %v6106_v18 = vpack.c.bf16 %v6064_v59, %v6062_v31 }
  0xcf   : > { %4700 = vmatpush3.bf16.msra.mxu1 %v5999_v27  ;;  %v1455_v46 = vand.u32 4294901760, %v1454_v12  ;;  %v1475_v57 = vsub.f32 %v6073_v45, %v6909_v50  ;;  %v1482_v16 = vsub.f32 %v6075_v22, %v6908_v24  ;;  %v6110_v44 = vpack.c.bf16 %v6075_v22, %v6073_v45 }
  0xd0   : > { %4702 = vmatprep.subr.bf16.mxu1 %v6003_v23  ;;  %v1461_v3 = vsub.f32 %v6062_v31, %v6911_v2  ;;  %v1468_v51 = vsub.f32 %v6064_v59, %v6910_v5  ;;  %v6115_v26 = vsub.f32 %v5932_v58, %v1219_v7  ;;  %v6120_v1 = vsub.f32 %v5934_v8, %v1222_v38 }
  0xd1   : > { %v6068_v53 = vpack.c.bf16 %v1455_v46, %v1448_v29  ;;  %v1476_v21 = vand.u32 4294901760, %v1475_v57  ;;  %v1483_v14 = vand.u32 4294901760, %v1482_v16  ;;  %v6127_v29 = vsub.f32 %v5946_v0, %v1225_v35  ;;  %v6132_v46 = vld [vmem:[%s6884_s2] ss:$0 sm:$0xff] }
  0xd2   : > { %v1462_v41 = vand.u32 4294901760, %v1461_v3  ;;  %v1469_v42 = vand.u32 4294901760, %v1468_v51  ;;  %v6919_v15 = vand.u32 4294901760, %v6115_v26  ;;  %v6918_v12 = vand.u32 4294901760, %v6120_v1 }
  0xd3   : > { %4704 = vmatpush3.bf16.msra.mxu1 %v6003_v23  ;;  %v6090_v62 = vpack.c.bf16 %v1483_v14, %v1476_v21  ;;  %v6137_v58 = vsub.f32 %v5948_v39, %v1228_v20  ;;  %v6152_v50 = vsub.f32 %v5962_v61, %v1231_v32  ;;  %v6167_v32 = vsub.f32 %v5964_v63, %v1234_v43 }
  0xd4   : > { %4706 = vmatprep.subr.bf16.mxu1 %v6007_v6  ;;  %v6088_v19 = vpack.c.bf16 %v1469_v42, %v1462_v41  ;;  %v1391_v38 = vsub.f32 %v6115_v26, %v6919_v15  ;;  %v1398_v0 = vsub.f32 %v6120_v1, %v6918_v12  ;;  %v6917_v41 = vand.u32 4294901760, %v6127_v29 }
  0xd5   : > { %v6916_v39 = vand.u32 4294901760, %v6137_v58 }
  0xd6   : > { %v1392_v14 = vand.u32 4294901760, %v1391_v38  ;;  %v1399_v24 = vand.u32 4294901760, %v1398_v0 }
  0xd7   : > { %4708 = vmatpush3.bf16.msra.mxu1 %v6007_v6  ;;  %v1412_v38 = vsub.f32 %v6137_v58, %v6916_v39 }
  0xd8   : > { %4710 = vmatprep.subr.bf16.mxu1 %v6023_v33 }
  0xdb   : > { %4712 = vmatpush3.bf16.msra.mxu1 %v6023_v33 }
  0xdc   : > { %4714 = vmatprep.subr.bf16.mxu1 %v6033_v4 }
 0x190   : > { %v3819_v8 = vpop.f32.mrb[0].mxu1  ;;  %v3951_v7 = vpop.f32.mrb[0].mxu0 }
 0x191   : > { %v5065_v35 = vadd.f32 %v3819_v8, %v6132_v46  ;;  %v691_v3 = vpop.f32.mrb[1].mxu1  ;;  %v1133_v51 = vpop.f32.mrb[1].mxu0 }
 0x192   : > { %v5067_v42 = vadd.f32 %v6132_v46, %v691_v3  ;;  %v1405_v3 = vsub.f32 %v6127_v29, %v6917_v41 }
 0x193   : > { %v5066_v20 = vadd.f32 %v5065_v35, %v3951_v7 }
 0x194   : > { %v5068_v57 = vadd.f32 %v5067_v42, %v1133_v51  ;;  %v3822_v16 = vpop.f32.mrb[2].mxu1  ;;  %v3954_v21 = vpop.f32.mrb[2].mxu0  ;;  %v1406_v39 = vand.u32 4294901760, %v1405_v3 }
 0x195   : > { %v1180_v8 = vmax.f32 %v5066_v20, 0.0  ;;  %v5069_v5 = vadd.f32 %v3822_v16, %v6132_v46  ;;  %v705_v2 = vpop.f32.mrb[3].mxu1  ;;  %v1145_v17 = vpop.f32.mrb[3].mxu0 }
 0x196   : > { %v1179_v7 = vmax.f32 %v5068_v57, 0.0  ;;  %v5071_v35 = vadd.f32 %v6132_v46, %v705_v2  ;;  %v6171_v57 = vpack.c.bf16 %v1399_v24, %v1392_v14  ;;  %v6922_v2 = vand.u32 4294901760, %v6152_v50 }
 0x197   : > { %v6162_v0 = vand.u32 4294901760, %v1180_v8  ;;  %v5070_v61 = vadd.f32 %v5069_v5, %v3954_v21 }
 0x198   : > { %v6169_v51 = vand.u32 4294901760, %v1179_v7  ;;  %v5072_v42 = vadd.f32 %v5071_v35, %v1145_v17  ;;  %v3825_v20 = vpop.f32.mrb[4].mxu1  ;;  %v3957_v16 = vpop.f32.mrb[4].mxu0  ;;  %v1413_v35 = vand.u32 4294901760, %v1412_v38 }
 0x199   : > { %v6175_v11 = vsub.f32 %v1180_v8, %v6162_v0  ;;  %v1182_v40 = vmax.f32 %v5070_v61, 0.0  ;;  %v5073_v5 = vadd.f32 %v3825_v20, %v6132_v46  ;;  %v719_v21 = vpop.f32.mrb[5].mxu1  ;;  %v1157_v13 = vpop.f32.mrb[5].mxu0 }
 0x19a   : > { %v6179_v63 = vsub.f32 %v1179_v7, %v6169_v51  ;;  %v1181_v43 = vmax.f32 %v5072_v42, 0.0  ;;  %v5075_v17 = vadd.f32 %v6132_v46, %v719_v21  ;;  %v1419_v7 = vsub.f32 %v6152_v50, %v6922_v2 }
 0x19b   : > { %v6923_v24 = vand.u32 4294901760, %v6175_v11  ;;  %v6183_v14 = vand.u32 4294901760, %v1182_v40  ;;  %v5074_v41 = vadd.f32 %v5073_v5, %v3957_v16 }
 0x19c   : > { %v6186_v61 = vand.u32 4294901760, %v1181_v43  ;;  %v5076_v20 = vadd.f32 %v5075_v17, %v1157_v13  ;;  %v3828_v12 = vpop.f32.mrb[6].mxu1  ;;  %v3960_v15 = vpop.f32.mrb[6].mxu0  ;;  %v6926_v3 = vand.u32 4294901760, %v6179_v63 }
 0x19d   : > { %v1306_v38 = vsub.f32 %v6175_v11, %v6923_v24  ;;  %v6196_v42 = vsub.f32 %v1182_v40, %v6183_v14  ;;  %v1184_v16 = vmax.f32 %v5074_v41, 0.0  ;;  %v5077_v5 = vadd.f32 %v3828_v12, %v6132_v46  ;;  %v733_v21 = vpop.f32.mrb[7].mxu1  ;;  %v1169_v13 = vpop.f32.mrb[7].mxu0 }
 0x19e   : > { %v6200_v17 = vsub.f32 %v1181_v43, %v6186_v61  ;;  %v1183_v54 = vmax.f32 %v5076_v20, 0.0  ;;  %v5079_v30 = vadd.f32 %v6132_v46, %v733_v21  ;;  %v1296_v2 = vsub.f32 %v6179_v63, %v6926_v3 }
 0x19f   : > { %v6206_v8 = vand.u32 4294901760, %v1184_v16  ;;  %v5078_v24 = vadd.f32 %v5077_v5, %v3960_v15  ;;  %v1325_v40 = vand.u32 4294901760, %v6196_v42  ;;  %v6995_v41 = vand.u32 4294901760, %v6167_v32 }
 0x1a0   : > { %v6212_v22 = vand.u32 4294901760, %v1183_v54  ;;  %v5080_v43 = vadd.f32 %v5079_v30, %v1169_v13  ;;  %v1297_v45 = vand.u32 4294901760, %v1296_v2  ;;  %v1315_v20 = vand.u32 4294901760, %v6200_v17 }
 0x1a1   : > { %v1426_v12 = vsub.f32 %v6167_v32, %v6995_v41  ;;  %v1307_v46 = vand.u32 4294901760, %v1306_v38  ;;  %v6216_v21 = vsub.f32 %v1184_v16, %v6206_v8  ;;  %v1186_v3 = vmax.f32 %v5078_v24, 0.0 }
 0x1a2   : > { %v1326_v15 = vsub.f32 %v6196_v42, %v1325_v40  ;;  %v6222_v5 = vsub.f32 %v1183_v54, %v6212_v22  ;;  %v1185_v59 = vmax.f32 %v5080_v43, 0.0  ;;  %3993 = vmatprep.mubr.f32.mxu1 %v1297_v45  ;;  %v1316_v30 = vsub.f32 %v6200_v17, %v1315_v20 }
 0x1a3   : > { %v6227_v2 = vand.u32 4294901760, %v1186_v3  ;;  %3994 = vmatmul.mubr.f32.vlgmr.msra.gmra.mrb[8].mxu1 %v1307_v46  ;;  %v4721_v38 = vpack.c.bf16 %v1413_v35, %v1406_v39  ;;  %v6928_v16 = vand.u32 4294901760, %v6216_v21  ;;  %v1420_v41 = vand.u32 4294901760, %v1419_v7 }
 0x1a4   : > { %v6230_v24 = vand.u32 4294901760, %v1185_v59  ;;  %4716 = vmatpush3.bf16.msra.mxu1 %v6033_v4  ;;  %v1317_v13 = vand.u32 4294901760, %v1316_v30  ;;  %v1335_v54 = vand.u32 4294901760, %v6222_v5  ;;  %v1327_v43 = vand.u32 4294901760, %v1326_v15 }
 0x1a5   : > { %v6235_v45 = vsub.f32 %v1186_v3, %v6227_v2  ;;  %4718 = vmatprep.subr.bf16.mxu1 %v6171_v57  ;;  %v1346_v39 = vsub.f32 %v6216_v21, %v6928_v16  ;;  %v1427_v35 = vand.u32 4294901760, %v1426_v12 }
 0x1a6   : > { %v6242_v46 = vsub.f32 %v1185_v59, %v6230_v24  ;;  %3996 = vmatprep.mubr.f32.mxu1 %v1317_v13  ;;  %v1336_v4 = vsub.f32 %v6222_v5, %v1335_v54 }
 0x1a7   : > { %3997 = vmatmul.mubr.f32.gmra.mrb[10].mxu1 %v1327_v43  ;;  %v1365_v3 = vand.u32 4294901760, %v6235_v45  ;;  %v1347_v30 = vand.u32 4294901760, %v1346_v39  ;;  %v4725_v16 = vpack.c.bf16 %v1427_v35, %v1420_v41  ;;  %v6289_v43 = vld [vmem:[#allocation5 + $0x118] sm:$0xff]  ;;  %v6292_v35 = vld [vmem:[#allocation5 + $0x120] sm:$0xff] }
 0x1a8   : > { %4720 = vmatpush3.bf16.msra.mxu1 %v6171_v57  ;;  %v1337_v7 = vand.u32 4294901760, %v1336_v4  ;;  %v1355_v15 = vand.u32 4294901760, %v6242_v46  ;;  %v6294_v4 = vld [vmem:[#allocation5 + $0x128] sm:$0xff] }
 0x1a9   : > { %4722 = vmatprep.subr.bf16.mxu1 %v4721_v38  ;;  %v1366_v59 = vsub.f32 %v6235_v45, %v1365_v3 }
 0x1aa   : > { %3999 = vmatprep.mubr.f32.mxu1 %v1337_v7  ;;  %v1356_v12 = vsub.f32 %v6242_v46, %v1355_v15  ;;  %v6929_v7 = vand.u32 4294901760, %v6289_v43 }
 0x1ab   : > { %4000 = vmatmul.mubr.f32.gmra.mrb[12].mxu1 %v1347_v30  ;;  %v1367_v57 = vand.u32 4294901760, %v1366_v59  ;;  %v2200_v59 = vand.u32 4294901760, %v6292_v35 }
 0x1ac   : > { %4724 = vmatpush3.bf16.msra.mxu1 %v4721_v38  ;;  %v1357_v13 = vand.u32 4294901760, %v1356_v12  ;;  %v4749_v38 = vpack.c.bf16 %v6120_v1, %v6115_v26  ;;  %v6932_v12 = vand.u32 4294901760, %v6294_v4 }
 0x1ad   : > { %4726 = vmatprep.subr.bf16.mxu1 %v4725_v16 }
 0x1ae   : > { %4002 = vmatprep.mubr.f32.mxu1 %v1357_v13 }
 0x1af   : > { %4003 = vmatmul.mubr.f32.gmra.mrb[14].mxu1 %v1367_v57  ;;  %v6312_v57 = vld [vmem:[#allocation5 + $0x130] sm:$0xff] }
 0x1b0   : > { %4728 = vmatpush3.bf16.msra.mxu1 %v4725_v16  ;;  %4037 = vmatprep.mubr.f32.mxu1 %v6169_v51 }
 0x1b1   : > { %4730 = vmatprep.subr.bf16.mxu1 %v6054_v25 }
 0x1b4   : > { %4732 = vmatpush3.bf16.msra.mxu1 %v6054_v25  ;;  %v4753_v25 = vpack.c.bf16 %v6137_v58, %v6127_v29 }
 0x1b5   : > { %4734 = vmatprep.subr.bf16.mxu1 %v6068_v53 }
 0x1b8   : > { %4736 = vmatpush3.bf16.msra.mxu1 %v6068_v53  ;;  %v4757_v53 = vpack.c.bf16 %v6167_v32, %v6152_v50 }
 0x1b9   : > { %4738 = vmatprep.subr.bf16.mxu1 %v6088_v19 }
 0x1bc   : > { %4740 = vmatpush3.bf16.msra.mxu1 %v6088_v19  ;;  %v6280_v19 = vld [vmem:[#allocation5 + $0x100] sm:$0xff] }
 0x1bd   : > { %4742 = vmatprep.subr.bf16.mxu1 %v6090_v62  ;;  %v2188_v16 = vand.u32 4294901760, %v6280_v19 }
 0x1c0   : > { %4744 = vmatpush3.bf16.msra.mxu1 %v6090_v62  ;;  %v6282_v62 = vld [vmem:[#allocation5 + $0x108] sm:$0xff] }
 0x1c1   : > { %4746 = vmatprep.subr.bf16.mxu1 %v6094_v9  ;;  %v2191_v41 = vand.u32 4294901760, %v6282_v62 }
 0x1c3   : > { %4038 = vmatmul.mubr.f32.vlgmr.msra.gmra.mrb[8].mxu1 %v6162_v0  ;;  %v6302_v30 = vpack.c.bf16 %v2191_v41, %v2188_v16 }
 0x1c4   : > { %4040 = vmatprep.mubr.f32.mxu1 %v6186_v61  ;;  %4748 = vmatpush3.bf16.msra.mxu1 %v6094_v9  ;;  %v6284_v9 = vld [vmem:[#allocation5 + $0x110] sm:$0xff] }
 0x1c5   : > { %4750 = vmatprep.subr.bf16.mxu1 %v4749_v38  ;;  %v2194_v39 = vand.u32 4294901760, %v6284_v9  ;;  %4874 = vmatprep.subr.bf16.mxu0 %v6302_v30 }
 0x1c6   : > { %4876 = vmatpush3.bf16.msra.mxu0 %v6302_v30 }
 0x1c7   : > { %4041 = vmatmul.mubr.f32.gmra.mrb[10].mxu1 %v6183_v14  ;;  %v6310_v13 = vpack.c.bf16 %v6929_v7, %v2194_v39 }
 0x1c8   : > { %4043 = vmatprep.mubr.f32.mxu1 %v6212_v22  ;;  %4752 = vmatpush3.bf16.msra.mxu1 %v4749_v38  ;;  %v6314_v38 = vld [vmem:[#allocation5 + $0x138] sm:$0xff] }
 0x1c9   : > { %4754 = vmatprep.subr.bf16.mxu1 %v4753_v25  ;;  %4878 = vmatprep.subr.bf16.mxu0 %v6310_v13  ;;  %v6930_v7 = vand.u32 4294901760, %v6314_v38 }
 0x1ca   : > { %4880 = vmatpush3.bf16.msra.mxu0 %v6310_v13 }
 0x1cb   : > { %4044 = vmatmul.mubr.f32.gmra.mrb[12].mxu1 %v6206_v8 }
 0x1cc   : > { %4046 = vmatprep.mubr.f32.mxu1 %v6230_v24  ;;  %4756 = vmatpush3.bf16.msra.mxu1 %v4753_v25  ;;  %v6325_v25 = vpack.c.bf16 %v6932_v12, %v2200_v59  ;;  %v7001_v12 = vand.u32 4294901760, %v6175_v11 }
 0x1cd   : > { %4758 = vmatprep.subr.bf16.mxu1 %v4757_v53 }
 0x1ce   : > { %4882 = vmatprep.subr.bf16.mxu0 %v6325_v25 }
 0x1cf   : > { %4047 = vmatmul.mubr.f32.gmra.mrb[14].mxu1 %v6227_v2  ;;  %4884 = vmatpush3.bf16.msra.mxu0 %v6325_v25 }
 0x1d0   : > { %4760 = vmatpush3.bf16.msra.mxu1 %v4757_v53  ;;  %4081 = vmatprep.mubr.f32.mxu1 %v6179_v63  ;;  %v6931_v53 = vand.u32 4294901760, %v6312_v57 }
 0x1d1   : > { %4762 = vmatprep.subr.bf16.mxu1 %v6098_v37 }
 0x1d4   : > { %4764 = vmatpush3.bf16.msra.mxu1 %v6098_v37  ;;  %v6337_v37 = vpack.c.bf16 %v6930_v7, %v6931_v53  ;;  %v7000_v7 = vand.u32 4294901760, %v6120_v1 }
 0x1d5   : > { %4766 = vmatprep.subr.bf16.mxu1 %v6102_v47 }
 0x1d6   : > { %4886 = vmatprep.subr.bf16.mxu0 %v6337_v37 }
 0x1d7   : > { %4888 = vmatpush3.bf16.msra.mxu0 %v6337_v37 }
 0x1d8   : > { %4768 = vmatpush3.bf16.msra.mxu1 %v6102_v47  ;;  %v6996_v47 = vand.u32 4294901760, %v6179_v63 }
 0x1d9   : > { %4770 = vmatprep.subr.bf16.mxu1 %v6106_v18 }
 0x1dc   : > { %4772 = vmatpush3.bf16.msra.mxu1 %v6106_v18  ;;  %v6997_v18 = vand.u32 4294901760, %v6012_v60  ;;  %v7002_v60 = vand.u32 4294901760, %v6127_v29  ;;  %v7007_v29 = vand.u32 4294901760, %v6036_v34  ;;  %v7012_v34 = vld [vmem:[#allocation12_spill] sm:$0xff] }
 0x1dd   : > { %4774 = vmatprep.subr.bf16.mxu1 %v6110_v44 }
 0x1e0   : > { %4776 = vmatpush3.bf16.msra.mxu1 %v6110_v44  ;;  %v6998_v44 = vand.u32 4294901760, %v6017_v48  ;;  %v7003_v48 = vand.u32 4294901760, %v6137_v58  ;;  %v7008_v58 = vand.u32 4294901760, %v6038_v10 }
 0x1e1   : > { %4778 = vmatprep.subr.bf16.mxu1 %v5942_v28 }
 0x1e2   : > { %v4809_v63 = vpack.c.bf16 %v6998_v44, %v6997_v18  ;;  %v4817_v18 = vpack.c.bf16 %v7003_v48, %v7002_v60 }
 0x1e3   : > { %4082 = vmatmul.mubr.f32.vlgmr.msra.gmra.mrb[8].mxu1 %v6175_v11  ;;  %v7004_v11 = vand.u32 4294901760, %v6152_v50  ;;  %v7009_v50 = vand.u32 4294901760, %v6048_v49 }
 0x1e4   : > { %4084 = vmatprep.mubr.f32.mxu1 %v6200_v17  ;;  %4780 = vmatpush3.bf16.msra.mxu1 %v5942_v28  ;;  %v7006_v17 = vand.u32 4294901760, %v6216_v21 }
 0x1e5   : > { %4782 = vmatprep.subr.bf16.mxu1 %v5956_v36 }
 0x1e7   : > { %4085 = vmatmul.mubr.f32.gmra.mrb[10].mxu1 %v6196_v42  ;;  %v4825_v42 = vpack.c.bf16 %v7008_v58, %v7007_v29 }
 0x1e8   : > { %4087 = vmatprep.mubr.f32.mxu1 %v6222_v5  ;;  %4784 = vmatpush3.bf16.msra.mxu1 %v5956_v36  ;;  %v7014_v5 = vld [vmem:[#allocation11_spill] sm:$0xff] }
 0x1e9   : > { %4786 = vmatprep.subr.bf16.mxu1 %v5974_v56 }
 0x1eb   : > { %4088 = vmatmul.mubr.f32.gmra.mrb[12].mxu1 %v6216_v21  ;;  %v7013_v21 = vand.u32 4294901760, %v7012_v34 }
 0x1ec   : > { %4090 = vmatprep.mubr.f32.mxu1 %v6242_v46  ;;  %4788 = vmatpush3.bf16.msra.mxu1 %v5974_v56 }
 0x1ed   : > { %4790 = vmatprep.subr.bf16.mxu1 %v5988_v55 }
 0x1ef   : > { %4091 = vmatmul.mubr.f32.gmra.mrb[14].mxu1 %v6235_v45  ;;  %v7016_v45 = vld [vmem:[#allocation13_spill] sm:$0xff] }
 0x1f0   : > { %4792 = vmatpush3.bf16.msra.mxu1 %v5988_v55  ;;  %4125 = vmatprep.mubr.f32.mxu1 %v6996_v47  ;;  %v6999_v47 = vand.u32 4294901760, %v6115_v26  ;;  %v7005_v26 = vand.u32 4294901760, %v6167_v32  ;;  %v7010_v32 = vand.u32 4294901760, %v6050_v52  ;;  %v7017_v46 = vand.u32 4294901760, %v7016_v45 }
 0x1f1   : > { %4794 = vmatprep.subr.bf16.mxu1 %v5999_v27 }
 0x1f2   : > { %v4813_v53 = vpack.c.bf16 %v7000_v7, %v6999_v47  ;;  %v4821_v1 = vpack.c.bf16 %v7005_v26, %v7004_v11 }
 0x1f4   : > { %4796 = vmatpush3.bf16.msra.mxu1 %v5999_v27 }
 0x1f5   : > { %4798 = vmatprep.subr.bf16.mxu1 %v6003_v23 }
 0x1f8   : > { %4800 = vmatpush3.bf16.msra.mxu1 %v6003_v23 }
 0x1f9   : > { %4802 = vmatprep.subr.bf16.mxu1 %v6007_v6 }
 0x1fc   : > { %4804 = vmatpush3.bf16.msra.mxu1 %v6007_v6 }
 0x1fd   : > { %4806 = vmatprep.subr.bf16.mxu1 %v6023_v33 }
 0x200   : > { %4808 = vmatpush3.bf16.msra.mxu1 %v6023_v33 }
 0x201   : > { %4810 = vmatprep.subr.bf16.mxu1 %v4809_v63 }
 0x203   : > { %4126 = vmatmul.mubr.f32.vlgmr.msra.gmra.mrb[8].mxu1 %v7001_v12 }
 0x204   : > { %4128 = vmatprep.mubr.f32.mxu1 %v1315_v20  ;;  %4812 = vmatpush3.bf16.msra.mxu1 %v4809_v63  ;;  %v7011_v20 = vand.u32 4294901760, %v6062_v31  ;;  %v2175_v31 = vld [vmem:[#allocation5 + $0x160] sm:$0xff] }
 0x205   : > { %4814 = vmatprep.subr.bf16.mxu1 %v4813_v53 }
 0x206   : > { %v4833_v10 = vpack.c.bf16 %v7013_v21, %v7011_v20 }
 0x207   : > { %4129 = vmatmul.mubr.f32.gmra.mrb[10].mxu1 %v1325_v40  ;;  %v4829_v40 = vpack.c.bf16 %v7010_v32, %v7009_v50 }
 0x208   : > { %4131 = vmatprep.mubr.f32.mxu1 %v1335_v54  ;;  %4816 = vmatpush3.bf16.msra.mxu1 %v4813_v53  ;;  %v7015_v54 = vand.u32 4294901760, %v7014_v5 }
 0x209   : > { %4818 = vmatprep.subr.bf16.mxu1 %v4817_v18 }
 0x20b   : > { %4132 = vmatmul.mubr.f32.gmra.mrb[12].mxu1 %v7006_v17 }
 0x20c   : > { %4134 = vmatprep.mubr.f32.mxu1 %v1355_v15  ;;  %4820 = vmatpush3.bf16.msra.mxu1 %v4817_v18 }
 0x20d   : > { %4822 = vmatprep.subr.bf16.mxu1 %v4821_v1 }
 0x20f   : > { %4135 = vmatmul.mubr.f32.gmra.mrb[14].mxu1 %v1365_v3  ;;  %v4837_v3 = vpack.c.bf16 %v7017_v46, %v7015_v54 }
 0x210   : > { %4824 = vmatpush3.bf16.msra.mxu1 %v4821_v1  ;;  %4169 = vmatprep.mubr.f32.mxu1 %v6169_v51 }
 0x211   : > { %4826 = vmatprep.subr.bf16.mxu1 %v4825_v42 }
 0x214   : > { %4828 = vmatpush3.bf16.msra.mxu1 %v4825_v42 }
 0x215   : > { %4830 = vmatprep.subr.bf16.mxu1 %v4829_v40 }
 0x218   : > { %4832 = vmatpush3.bf16.msra.mxu1 %v4829_v40 }
 0x219   : > { %4834 = vmatprep.subr.bf16.mxu1 %v4833_v10 }
 0x21c   : > { %4836 = vmatpush3.bf16.msra.mxu1 %v4833_v10 }
 0x21d   : > { %4838 = vmatprep.subr.bf16.mxu1 %v4837_v3 }
 0x220   : > { %4840 = vmatpush3.bf16.msra.mxu1 %v4837_v3 }
 0x221   : > { %4842 = vmatprep.subr.bf16.mxu1 %v5942_v28 }
 0x223   : > { %4170 = vmatmul.mubr.f32.vlgmr.msra.gmra.mrb[8].mxu1 %v6162_v0 }
 0x224   : > { %4172 = vmatprep.mubr.f32.mxu1 %v6186_v61  ;;  %4844 = vmatpush3.bf16.msra.mxu1 %v5942_v28  ;;  %v2171_v28 = vld [vmem:[#allocation5 + $0x140] sm:$0xff] }
 0x225   : > { %4846 = vmatprep.subr.bf16.mxu1 %v5956_v36 }
 0x227   : > { %4173 = vmatmul.mubr.f32.gmra.mrb[10].mxu1 %v6183_v14 }
 0x228   : > { %4175 = vmatprep.mubr.f32.mxu1 %v6212_v22  ;;  %4848 = vmatpush3.bf16.msra.mxu1 %v5956_v36  ;;  %v2172_v36 = vld [vmem:[#allocation5 + $0x148] sm:$0xff] }
 0x229   : > { %4850 = vmatprep.subr.bf16.mxu1 %v5974_v56 }
 0x22b   : > { %4176 = vmatmul.mubr.f32.gmra.mrb[12].mxu1 %v6206_v8 }
 0x22c   : > { %4178 = vmatprep.mubr.f32.mxu1 %v6230_v24  ;;  %4852 = vmatpush3.bf16.msra.mxu1 %v5974_v56  ;;  %v2212_v56 = vand.u32 4294901760, %v2171_v28 }
 0x22d   : > { %4854 = vmatprep.subr.bf16.mxu1 %v5988_v55 }
 0x22e   : > { %v6485_v47 = vsub.f32 %v2171_v28, %v2212_v56 }
 0x22f   : > { %4179 = vmatmul.mubr.f32.gmra.mrb[14].mxu1 %v6227_v2 }
 0x230   : > { %4856 = vmatpush3.bf16.msra.mxu1 %v5988_v55  ;;  %4213 = vmatprep.mubr.f32.mxu1 %v6169_v51  ;;  %v2215_v55 = vand.u32 4294901760, %v2172_v36  ;;  %v6940_v48 = vand.u32 4294901760, %v6485_v47 }
 0x231   : > { %4858 = vmatprep.subr.bf16.mxu1 %v5999_v27 }
 0x232   : > { %v6487_v60 = vsub.f32 %v2172_v36, %v2215_v55  ;;  %v2408_v11 = vsub.f32 %v6485_v47, %v6940_v48 }
 0x234   : > { %4860 = vmatpush3.bf16.msra.mxu1 %v5999_v27  ;;  %v6448_v27 = vpack.c.bf16 %v2215_v55, %v2212_v56  ;;  %v6939_v18 = vand.u32 4294901760, %v6487_v60  ;;  %v2409_v29 = vand.u32 4294901760, %v2408_v11 }
 0x235   : > { %4862 = vmatprep.subr.bf16.mxu1 %v6003_v23 }
 0x236   : > { %4890 = vmatprep.subr.bf16.mxu0 %v6448_v27  ;;  %v2415_v26 = vsub.f32 %v6487_v60, %v6939_v18 }
 0x237   : > { %4892 = vmatpush3.bf16.msra.mxu0 %v6448_v27 }
 0x238   : > { %4864 = vmatpush3.bf16.msra.mxu1 %v6003_v23  ;;  %v2173_v23 = vld [vmem:[#allocation5 + $0x150] sm:$0xff]  ;;  %v2416_v58 = vand.u32 4294901760, %v2415_v26 }
 0x239   : > { %4866 = vmatprep.subr.bf16.mxu1 %v6007_v6 }
 0x23a   : > { %v6503_v32 = vpack.c.bf16 %v2416_v58, %v2409_v29  ;;  %v3255_v58 = vld [vmem:[%s6884_s2 + $0x1] ss:$0 sm:$0xff] }
 0x23c   : > { %4868 = vmatpush3.bf16.msra.mxu1 %v6007_v6  ;;  %v2174_v6 = vld [vmem:[#allocation5 + $0x158] sm:$0xff] }
 0x23d   : > { %4870 = vmatprep.subr.bf16.mxu1 %v6023_v33  ;;  %v2221_v49 = vand.u32 4294901760, %v2174_v6 }
 0x23f   : > { %v6499_v17 = vsub.f32 %v2174_v6, %v2221_v49 }
 0x240   : > { %4872 = vmatpush3.bf16.msra.mxu1 %v6023_v33  ;;  %v2218_v33 = vand.u32 4294901760, %v2173_v23 }
 0x241   : > { %v6937_v50 = vand.u32 4294901760, %v6499_v17 }
 0x242   : > { %v6452_v52 = vpack.c.bf16 %v2221_v49, %v2218_v33  ;;  %v6497_v1 = vsub.f32 %v2173_v23, %v2218_v33 }
 0x243   : > { %4214 = vmatmul.mubr.f32.vlgmr.msra.gmra.mrb[8].mxu1 %v6162_v0  ;;  %v2224_v0 = vand.u32 4294901760, %v2175_v31  ;;  %v2429_v20 = vsub.f32 %v6499_v17, %v6937_v50 }
 0x244   : > { %4216 = vmatprep.mubr.f32.mxu1 %v6186_v61  ;;  %4894 = vmatprep.subr.bf16.mxu0 %v6452_v52  ;;  %v6466_v61 = vsub.f32 %v6282_v62, %v2191_v41  ;;  %v6938_v42 = vand.u32 4294901760, %v6497_v1 }
 0x245   : > { %4896 = vmatpush3.bf16.msra.mxu0 %v6452_v52  ;;  %v6511_v34 = vsub.f32 %v2175_v31, %v2224_v0  ;;  %v2430_v5 = vand.u32 4294901760, %v2429_v20 }
 0x246   : > { %v6946_v53 = vand.u32 4294901760, %v6466_v61  ;;  %v2422_v40 = vsub.f32 %v6497_v1, %v6938_v42 }
 0x247   : > { %4217 = vmatmul.mubr.f32.gmra.mrb[10].mxu1 %v6183_v14  ;;  %v6936_v54 = vand.u32 4294901760, %v6511_v34 }
 0x248   : > { %4219 = vmatprep.mubr.f32.mxu1 %v6212_v22  ;;  %v2176_v22 = vld [vmem:[#allocation5 + $0x168] sm:$0xff]  ;;  %v2359_v62 = vsub.f32 %v6466_v61, %v6946_v53  ;;  %v2423_v10 = vand.u32 4294901760, %v2422_v40  ;;  %v6579_v40 = vsub.f32 %v6292_v35, %v2200_v59 }
 0x249   : > { %v2227_v51 = vand.u32 4294901760, %v2176_v22  ;;  %v2436_v3 = vsub.f32 %v6511_v34, %v6936_v54 }
 0x24a   : > { %v2360_v41 = vand.u32 4294901760, %v2359_v62  ;;  %v6517_v46 = vpack.c.bf16 %v2430_v5, %v2423_v10  ;;  %v6942_v35 = vand.u32 4294901760, %v6579_v40 }
 0x24b   : > { %4220 = vmatmul.mubr.f32.gmra.mrb[12].mxu1 %v6206_v8  ;;  %v6456_v14 = vpack.c.bf16 %v2227_v51, %v2224_v0  ;;  %v6461_v8 = vsub.f32 %v6280_v19, %v2188_v16  ;;  %v6513_v21 = vsub.f32 %v2176_v22, %v2227_v51  ;;  %v2437_v55 = vand.u32 4294901760, %v2436_v3 }
 0x24c   : > { %4222 = vmatprep.mubr.f32.mxu1 %v6230_v24  ;;  %v2178_v24 = vld [vmem:[#allocation5 + $0x178] sm:$0xff] }
 0x24d   : > { %4898 = vmatprep.subr.bf16.mxu0 %v6456_v14  ;;  %v2233_v7 = vand.u32 4294901760, %v2178_v24  ;;  %v6947_v12 = vand.u32 4294901760, %v6461_v8  ;;  %7018 = vst [vmem:[#allocation14_spill] sm:$0xff] %v6513_v21  ;;  %v6935_v45 = vand.u32 4294901760, %v6513_v21 }
 0x24e   : > { %4900 = vmatpush3.bf16.msra.mxu0 %v6456_v14 }
 0x24f   : > { %4223 = vmatmul.mubr.f32.gmra.mrb[14].mxu1 %v6227_v2  ;;  %v2177_v2 = vld [vmem:[#allocation5 + $0x170] sm:$0xff]  ;;  %v2352_v19 = vsub.f32 %v6461_v8, %v6947_v12  ;;  %v6524_v36 = vsub.f32 %v2178_v24, %v2233_v7  ;;  %v2443_v56 = vsub.f32 %v6513_v21, %v6935_v45  ;;  %v6543_v24 = vpack.c.bf16 %v6466_v61, %v6461_v8 }
 0x250   : > { %v2230_v15 = vand.u32 4294901760, %v2177_v2 }
 0x251   : > { %v2353_v16 = vand.u32 4294901760, %v2352_v19  ;;  %7020 = vst [vmem:[#allocation16_spill] sm:$0xff] %v6524_v36  ;;  %v6933_v6 = vand.u32 4294901760, %v6524_v36  ;;  %v2444_v33 = vand.u32 4294901760, %v2443_v56  ;;  %v6555_v19 = vpack.c.bf16 %v6513_v21, %v6511_v34 }
 0x252   : > { %v6472_v44 = vpack.c.bf16 %v2233_v7, %v2230_v15  ;;  %v6522_v28 = vsub.f32 %v2177_v2, %v2230_v15  ;;  %v6547_v15 = vpack.c.bf16 %v6487_v60, %v6485_v47  ;;  %v6551_v7 = vpack.c.bf16 %v6499_v17, %v6497_v1 }
 0x253   : > { %v6482_v63 = vpack.c.bf16 %v2360_v41, %v2353_v16  ;;  %v2457_v31 = vsub.f32 %v6524_v36, %v6933_v6  ;;  %v6537_v22 = vpack.c.bf16 %v2444_v33, %v2437_v55  ;;  %v6564_v16 = vsub.f32 %v6284_v9, %v2194_v39 }
 0x254   : > { %4902 = vmatprep.subr.bf16.mxu0 %v6472_v44  ;;  %7019 = vst [vmem:[#allocation15_spill] sm:$0xff] %v6522_v28  ;;  %v6934_v23 = vand.u32 4294901760, %v6522_v28  ;;  %v6559_v62 = vpack.c.bf16 %v6524_v36, %v6522_v28  ;;  %v7021_v41 = vand.u32 4294901760, %v6289_v43  ;;  %v7022_v9 = vand.u32 4294901760, %v6294_v4 }
 0x255   : > { %4904 = vmatpush3.bf16.msra.mxu0 %v6472_v44  ;;  %v2458_v51 = vand.u32 4294901760, %v2457_v31  ;;  %v6944_v26 = vand.u32 4294901760, %v6564_v16 }
 0x256   : > { %4906 = vmatprep.subr.bf16.mxu0 %v6482_v63  ;;  %v2450_v49 = vsub.f32 %v6522_v28, %v6934_v23  ;;  %v6569_v11 = vsub.f32 %v6289_v43, %v7021_v41  ;;  %v6584_v39 = vsub.f32 %v6294_v4, %v7022_v9 }
 0x257   : > { %v2366_v20 = vsub.f32 %v6564_v16, %v6944_v26 }
 0x258   : > { %v2451_v0 = vand.u32 4294901760, %v2450_v49  ;;  %v6943_v29 = vand.u32 4294901760, %v6569_v11  ;;  %v6941_v55 = vand.u32 4294901760, %v6584_v39 }
 0x259   : > { %v2367_v49 = vand.u32 4294901760, %v2366_v20  ;;  %v2380_v20 = vsub.f32 %v6579_v40, %v6942_v35 }
 0x25a   : > { %v6539_v2 = vpack.c.bf16 %v2458_v51, %v2451_v0  ;;  %v2373_v10 = vsub.f32 %v6569_v11, %v6943_v29  ;;  %v7023_v0 = vand.u32 4294901760, %v6312_v57 }
 0x25c   : > { %v2374_v31 = vand.u32 4294901760, %v2373_v10  ;;  %v6597_v51 = vsub.f32 %v6312_v57, %v7023_v0 }
 0x25e   : > { %v4909_v23 = vpack.c.bf16 %v2374_v31, %v2367_v49 }
 0x316   : > { %v4215_v43 = vpop.f32.mrb[8].mxu1 }
 0x317   : > { %v5081_v5 = vadd.f32 %v4215_v43, %v3255_v58  ;;  %v2108_v3 = vpop.f32.mrb[9].mxu1 }
 0x318   : > { %v5082_v56 = vadd.f32 %v3255_v58, %v2108_v3  ;;  %v7024_v3 = vand.u32 4294901760, %v6314_v38 }
 0x319   : > { %v2155_v59 = vmax.f32 %v5081_v5, 0.0 }
 0x31a   : > { %v2154_v33 = vmax.f32 %v5082_v56, 0.0  ;;  %v4218_v4 = vpop.f32.mrb[10].mxu1  ;;  %v6604_v6 = vsub.f32 %v6314_v38, %v7024_v3 }
 0x31b   : > { %v6599_v41 = vand.u32 4294901760, %v2155_v59  ;;  %v5083_v9 = vadd.f32 %v4218_v4, %v3255_v58  ;;  %v2120_v43 = vpop.f32.mrb[11].mxu1  ;;  %v2387_v4 = vsub.f32 %v6584_v39, %v6941_v55 }
 0x31c   : > { %v6606_v5 = vand.u32 4294901760, %v2154_v33  ;;  %v5084_v56 = vadd.f32 %v3255_v58, %v2120_v43  ;;  %v6950_v43 = vand.u32 4294901760, %v6597_v51 }
 0x31d   : > { %v6612_v10 = vsub.f32 %v2155_v59, %v6599_v41  ;;  %v2157_v57 = vmax.f32 %v5083_v9, 0.0  ;;  %v6953_v9 = vand.u32 4294901760, %v6604_v6  ;;  %v2388_v55 = vand.u32 4294901760, %v2387_v4 }
 0x31e   : > { %v6618_v0 = vsub.f32 %v2154_v33, %v6606_v5  ;;  %v2156_v38 = vmax.f32 %v5084_v56, 0.0  ;;  %v4221_v3 = vpop.f32.mrb[12].mxu1  ;;  %v2381_v33 = vand.u32 4294901760, %v2380_v20  ;;  %v2394_v20 = vsub.f32 %v6597_v51, %v6950_v43 }
 0x31f   : > { %v6945_v45 = vand.u32 4294901760, %v6612_v10  ;;  %v6622_v54 = vand.u32 4294901760, %v2157_v57  ;;  %v5085_v50 = vadd.f32 %v4221_v3, %v3255_v58  ;;  %v2132_v59 = vpop.f32.mrb[13].mxu1  ;;  %v2401_v4 = vsub.f32 %v6604_v6, %v6953_v9 }
 0x320   : > { %v6625_v42 = vand.u32 4294901760, %v2156_v38  ;;  %v5086_v18 = vadd.f32 %v3255_v58, %v2132_v59  ;;  %v6948_v48 = vand.u32 4294901760, %v6618_v0  ;;  %v2395_v9 = vand.u32 4294901760, %v2394_v20 }
 0x321   : > { %v2281_v49 = vsub.f32 %v6612_v10, %v6945_v45  ;;  %v6632_v31 = vsub.f32 %v2157_v57, %v6622_v54  ;;  %v2159_v56 = vmax.f32 %v5085_v50, 0.0 }
 0x322   : > { %v6635_v3 = vsub.f32 %v2156_v38, %v6625_v42  ;;  %v2158_v35 = vmax.f32 %v5086_v18, 0.0  ;;  %v4224_v29 = vpop.f32.mrb[14].mxu1  ;;  %v2271_v59 = vsub.f32 %v6618_v0, %v6948_v48 }
 0x323   : > { %v6643_v26 = vand.u32 4294901760, %v2159_v56  ;;  %v5087_v45 = vadd.f32 %v4224_v29, %v3255_v58  ;;  %v2144_v57 = vpop.f32.mrb[15].mxu1  ;;  %v6954_v50 = vand.u32 4294901760, %v6632_v31  ;;  %v2282_v48 = vand.u32 4294901760, %v2281_v49 }
 0x324   : > { %v6649_v18 = vand.u32 4294901760, %v2158_v35  ;;  %v5088_v38 = vadd.f32 %v3255_v58, %v2144_v57  ;;  %v2272_v53 = vand.u32 4294901760, %v2271_v59  ;;  %v2290_v12 = vand.u32 4294901760, %v6635_v3 }
 0x325   : > { %v6653_v36 = vsub.f32 %v2159_v56, %v6643_v26  ;;  %v2161_v43 = vmax.f32 %v5087_v45, 0.0  ;;  %v2301_v29 = vsub.f32 %v6632_v31, %v6954_v50  ;;  %v4913_v49 = vpack.c.bf16 %v2388_v55, %v2381_v33 }
 0x326   : > { %v6659_v28 = vsub.f32 %v2158_v35, %v6649_v18  ;;  %v2160_v21 = vmax.f32 %v5088_v38, 0.0  ;;  %4257 = vmatprep.mubr.f32.mxu0 %v2272_v53  ;;  %v2291_v58 = vsub.f32 %v6635_v3, %v2290_v12  ;;  %v2402_v55 = vand.u32 4294901760, %v2401_v4 }
 0x327   : > { %v6664_v59 = vand.u32 4294901760, %v2161_v43  ;;  %4258 = vmatmul.mubr.f32.vlgmr.msra.gmra.mrb[8].mxu0 %v2282_v48  ;;  %v2320_v56 = vand.u32 4294901760, %v6653_v36  ;;  %v2302_v38 = vand.u32 4294901760, %v2301_v29 }
 0x328   : > { %v6667_v45 = vand.u32 4294901760, %v2160_v21  ;;  %4908 = vmatpush3.bf16.msra.mxu0 %v6482_v63  ;;  %v2292_v57 = vand.u32 4294901760, %v2291_v58  ;;  %v2310_v35 = vand.u32 4294901760, %v6659_v28  ;;  %v4917_v50 = vpack.c.bf16 %v2402_v55, %v2395_v9 }
 0x329   : > { %v6672_v53 = vsub.f32 %v2161_v43, %v6664_v59  ;;  %4910 = vmatprep.subr.bf16.mxu0 %v4909_v23  ;;  %v2321_v48 = vsub.f32 %v6653_v36, %v2320_v56  ;;  %v4941_v9 = vpack.c.bf16 %v6569_v11, %v6564_v16 }
 0x32a   : > { %v6678_v33 = vsub.f32 %v2160_v21, %v6667_v45  ;;  %4260 = vmatprep.mubr.f32.mxu0 %v2292_v57  ;;  %v2311_v63 = vsub.f32 %v6659_v28, %v2310_v35 }
 0x32b   : > { %4261 = vmatmul.mubr.f32.gmra.mrb[10].mxu0 %v2302_v38  ;;  %v2340_v20 = vand.u32 4294901760, %v6672_v53  ;;  %v2322_v58 = vand.u32 4294901760, %v2321_v48 }
 0x32c   : > { %4912 = vmatpush3.bf16.msra.mxu0 %v4909_v23  ;;  %v2312_v43 = vand.u32 4294901760, %v2311_v63  ;;  %v2330_v29 = vand.u32 4294901760, %v6678_v33 }
 0x32d   : > { %4914 = vmatprep.subr.bf16.mxu0 %v4913_v49  ;;  %v2341_v21 = vsub.f32 %v6672_v53, %v2340_v20 }
 0x32e   : > { %4263 = vmatprep.mubr.f32.mxu0 %v2312_v43  ;;  %v2331_v4 = vsub.f32 %v6678_v33, %v2330_v29 }
 0x32f   : > { %4264 = vmatmul.mubr.f32.gmra.mrb[12].mxu0 %v2322_v58  ;;  %v2342_v23 = vand.u32 4294901760, %v2341_v21 }
 0x330   : > { %4916 = vmatpush3.bf16.msra.mxu0 %v4913_v49  ;;  %v2332_v57 = vand.u32 4294901760, %v2331_v4  ;;  %v7033_v49 = vand.u32 4294901760, %v6632_v31 }
 0x331   : > { %4918 = vmatprep.subr.bf16.mxu0 %v4917_v50 }
 0x332   : > { %4266 = vmatprep.mubr.f32.mxu0 %v2332_v57 }
 0x333   : > { %4267 = vmatmul.mubr.f32.gmra.mrb[14].mxu0 %v2342_v23 }
 0x334   : > { %4920 = vmatpush3.bf16.msra.mxu0 %v4917_v50  ;;  %4301 = vmatprep.mubr.f32.mxu0 %v6606_v5 }
 0x335   : > { %4922 = vmatprep.subr.bf16.mxu0 %v6503_v32 }
 0x338   : > { %4924 = vmatpush3.bf16.msra.mxu0 %v6503_v32  ;;  %v4945_v32 = vpack.c.bf16 %v6584_v39, %v6579_v40 }
 0x339   : > { %4926 = vmatprep.subr.bf16.mxu0 %v6517_v46 }
 0x33c   : > { %4928 = vmatpush3.bf16.msra.mxu0 %v6517_v46  ;;  %v4949_v46 = vpack.c.bf16 %v6604_v6, %v6597_v51 }
 0x33d   : > { %4930 = vmatprep.subr.bf16.mxu0 %v6537_v22 }
 0x340   : > { %4932 = vmatpush3.bf16.msra.mxu0 %v6537_v22  ;;  %v7025_v22 = vand.u32 4294901760, %v6618_v0 }
 0x341   : > { %4934 = vmatprep.subr.bf16.mxu0 %v6539_v2 }
 0x344   : > { %4936 = vmatpush3.bf16.msra.mxu0 %v6539_v2  ;;  %v7026_v2 = vand.u32 4294901760, %v6461_v8  ;;  %v7031_v8 = vand.u32 4294901760, %v6579_v40  ;;  %v7036_v40 = vand.u32 4294901760, %v6485_v47  ;;  %v7041_v47 = vld [vmem:[#allocation14_spill] sm:$0xff] }
 0x345   : > { %4938 = vmatprep.subr.bf16.mxu0 %v6543_v24 }
 0x347   : > { %4302 = vmatmul.mubr.f32.vlgmr.msra.gmra.mrb[8].mxu0 %v6599_v41 }
 0x348   : > { %4304 = vmatprep.mubr.f32.mxu0 %v6625_v42  ;;  %4940 = vmatpush3.bf16.msra.mxu0 %v6543_v24  ;;  %v7027_v24 = vand.u32 4294901760, %v6466_v61  ;;  %v7032_v61 = vand.u32 4294901760, %v6584_v39 }
 0x349   : > { %4942 = vmatprep.subr.bf16.mxu0 %v4941_v9 }
 0x34a   : > { %v5009_v50 = vpack.c.bf16 %v7032_v61, %v7031_v8 }
 0x34b   : > { %4305 = vmatmul.mubr.f32.gmra.mrb[10].mxu0 %v6622_v54 }
 0x34c   : > { %4307 = vmatprep.mubr.f32.mxu0 %v6649_v18  ;;  %4944 = vmatpush3.bf16.msra.mxu0 %v4941_v9 }
 0x34d   : > { %4946 = vmatprep.subr.bf16.mxu0 %v4945_v32 }
 0x34f   : > { %4308 = vmatmul.mubr.f32.gmra.mrb[12].mxu0 %v6643_v26 }
 0x350   : > { %4310 = vmatprep.mubr.f32.mxu0 %v6667_v45  ;;  %4948 = vmatpush3.bf16.msra.mxu0 %v4945_v32 }
 0x351   : > { %4950 = vmatprep.subr.bf16.mxu0 %v4949_v46 }
 0x353   : > { %4311 = vmatmul.mubr.f32.gmra.mrb[14].mxu0 %v6664_v59 }
 0x354   : > { %4952 = vmatpush3.bf16.msra.mxu0 %v4949_v46  ;;  %4345 = vmatprep.mubr.f32.mxu0 %v6618_v0  ;;  %v7030_v0 = vand.u32 4294901760, %v6612_v10 }
 0x355   : > { %4954 = vmatprep.subr.bf16.mxu0 %v6547_v15 }
 0x358   : > { %4956 = vmatpush3.bf16.msra.mxu0 %v6547_v15  ;;  %v5001_v15 = vpack.c.bf16 %v7027_v24, %v7026_v2 }
 0x359   : > { %4958 = vmatprep.subr.bf16.mxu0 %v6551_v7 }
 0x35c   : > { %4960 = vmatpush3.bf16.msra.mxu0 %v6551_v7  ;;  %v7028_v7 = vand.u32 4294901760, %v6564_v16  ;;  %v7034_v16 = vand.u32 4294901760, %v6597_v51 }
 0x35d   : > { %4962 = vmatprep.subr.bf16.mxu0 %v6555_v19 }
 0x360   : > { %4964 = vmatpush3.bf16.msra.mxu0 %v6555_v19  ;;  %v7029_v19 = vand.u32 4294901760, %v6569_v11  ;;  %v7035_v11 = vand.u32 4294901760, %v6604_v6  ;;  %v7039_v6 = vand.u32 4294901760, %v6499_v17 }
 0x361   : > { %4966 = vmatprep.subr.bf16.mxu0 %v6559_v62 }
 0x364   : > { %4968 = vmatpush3.bf16.msra.mxu0 %v6559_v62  ;;  %v5005_v62 = vpack.c.bf16 %v7029_v19, %v7028_v7 }
 0x365   : > { %4970 = vmatprep.subr.bf16.mxu0 %v6302_v30 }
 0x367   : > { %4346 = vmatmul.mubr.f32.vlgmr.msra.gmra.mrb[8].mxu0 %v6612_v10  ;;  %v7040_v10 = vand.u32 4294901760, %v6511_v34 }
 0x368   : > { %4348 = vmatprep.mubr.f32.mxu0 %v6635_v3  ;;  %4972 = vmatpush3.bf16.msra.mxu0 %v6302_v30  ;;  %v7043_v3 = vld [vmem:[#allocation15_spill] sm:$0xff] }
 0x369   : > { %4974 = vmatprep.subr.bf16.mxu0 %v6310_v13 }
 0x36b   : > { %4349 = vmatmul.mubr.f32.gmra.mrb[10].mxu0 %v6632_v31  ;;  %v7042_v31 = vand.u32 4294901760, %v7041_v47 }
 0x36c   : > { %4351 = vmatprep.mubr.f32.mxu0 %v6659_v28  ;;  %4976 = vmatpush3.bf16.msra.mxu0 %v6310_v13  ;;  %v7037_v28 = vand.u32 4294901760, %v6487_v60 }
 0x36d   : > { %4978 = vmatprep.subr.bf16.mxu0 %v6325_v25  ;;  %v5025_v60 = vpack.c.bf16 %v7042_v31, %v7040_v10 }
 0x36e   : > { %v5017_v39 = vpack.c.bf16 %v7037_v28, %v7036_v40 }
 0x36f   : > { %4352 = vmatmul.mubr.f32.gmra.mrb[12].mxu0 %v6653_v36  ;;  %v7038_v36 = vand.u32 4294901760, %v6497_v1 }
 0x370   : > { %4354 = vmatprep.mubr.f32.mxu0 %v6678_v33  ;;  %4980 = vmatpush3.bf16.msra.mxu0 %v6325_v25 }
 0x371   : > { %4982 = vmatprep.subr.bf16.mxu0 %v6337_v37  ;;  %v5021_v51 = vpack.c.bf16 %v7039_v6, %v7038_v36 }
 0x373   : > { %4355 = vmatmul.mubr.f32.gmra.mrb[14].mxu0 %v6672_v53 }
 0x374   : > { %4984 = vmatpush3.bf16.msra.mxu0 %v6337_v37  ;;  %4389 = vmatprep.mubr.f32.mxu0 %v7025_v22 }
 0x375   : > { %4986 = vmatprep.subr.bf16.mxu0 %v6448_v27 }
 0x378   : > { %4988 = vmatpush3.bf16.msra.mxu0 %v6448_v27 }
 0x379   : > { %4990 = vmatprep.subr.bf16.mxu0 %v6452_v52 }
 0x37c   : > { %4992 = vmatpush3.bf16.msra.mxu0 %v6452_v52 }
 0x37d   : > { %4994 = vmatprep.subr.bf16.mxu0 %v6456_v14 }
 0x380   : > { %4996 = vmatpush3.bf16.msra.mxu0 %v6456_v14 }
 0x381   : > { %4998 = vmatprep.subr.bf16.mxu0 %v6472_v44 }
 0x384   : > { %5000 = vmatpush3.bf16.msra.mxu0 %v6472_v44 }
 0x385   : > { %5002 = vmatprep.subr.bf16.mxu0 %v5001_v15 }
 0x387   : > { %4390 = vmatmul.mubr.f32.vlgmr.msra.gmra.mrb[8].mxu0 %v7030_v0 }
 0x388   : > { %4392 = vmatprep.mubr.f32.mxu0 %v2290_v12  ;;  %5004 = vmatpush3.bf16.msra.mxu0 %v5001_v15  ;;  %v5013_v12 = vpack.c.bf16 %v7035_v11, %v7034_v16 }
 0x389   : > { %5006 = vmatprep.subr.bf16.mxu0 %v5005_v62 }
 0x38b   : > { %4393 = vmatmul.mubr.f32.gmra.mrb[10].mxu0 %v7033_v49 }
 0x38c   : > { %4395 = vmatprep.mubr.f32.mxu0 %v2310_v35  ;;  %5008 = vmatpush3.bf16.msra.mxu0 %v5005_v62  ;;  %v7045_v35 = vld [vmem:[#allocation16_spill] sm:$0xff] }
 0x38d   : > { %5010 = vmatprep.subr.bf16.mxu0 %v5009_v50  ;;  %v7046_v53 = vand.u32 4294901760, %v7045_v35 }
 0x38f   : > { %4396 = vmatmul.mubr.f32.gmra.mrb[12].mxu0 %v2320_v56  ;;  %v7044_v56 = vand.u32 4294901760, %v7043_v3 }
 0x390   : > { %4398 = vmatprep.mubr.f32.mxu0 %v2330_v29  ;;  %5012 = vmatpush3.bf16.msra.mxu0 %v5009_v50 }
 0x391   : > { %5014 = vmatprep.subr.bf16.mxu0 %v5013_v12  ;;  %v5029_v38 = vpack.c.bf16 %v7046_v53, %v7044_v56 }
 0x393   : > { %4399 = vmatmul.mubr.f32.gmra.mrb[14].mxu0 %v2340_v20 }
 0x394   : > { %5016 = vmatpush3.bf16.msra.mxu0 %v5013_v12  ;;  %4433 = vmatprep.mubr.f32.mxu0 %v6606_v5 }
 0x395   : > { %5018 = vmatprep.subr.bf16.mxu0 %v5017_v39 }
 0x398   : > { %5020 = vmatpush3.bf16.msra.mxu0 %v5017_v39 }
 0x399   : > { %5022 = vmatprep.subr.bf16.mxu0 %v5021_v51 }
 0x39c   : > { %5024 = vmatpush3.bf16.msra.mxu0 %v5021_v51 }
 0x39d   : > { %5026 = vmatprep.subr.bf16.mxu0 %v5025_v60 }
 0x3a0   : > { %5028 = vmatpush3.bf16.msra.mxu0 %v5025_v60 }
 0x3a1   : > { %5030 = vmatprep.subr.bf16.mxu0 %v5029_v38 }
 0x3a4   : > { %5032 = vmatpush3.bf16.msra.mxu0 %v5029_v38 }
 0x3a5   : > { %5034 = vmatprep.subr.bf16.mxu0 %v6302_v30 }
 0x3a7   : > { %4434 = vmatmul.mubr.f32.vlgmr.msra.gmra.mrb[8].mxu0 %v6599_v41 }
 0x3a8   : > { %4436 = vmatprep.mubr.f32.mxu0 %v6625_v42  ;;  %5036 = vmatpush3.bf16.msra.mxu0 %v6302_v30  ;;  %v3257_v30 = vld [vmem:[%s6884_s2 + $0x2] ss:$0 sm:$0xff] }
 0x3a9   : > { %5038 = vmatprep.subr.bf16.mxu0 %v6310_v13 }
 0x3ab   : > { %4437 = vmatmul.mubr.f32.gmra.mrb[10].mxu0 %v6622_v54 }
 0x3ac   : > { %4439 = vmatprep.mubr.f32.mxu0 %v6649_v18  ;;  %5040 = vmatpush3.bf16.msra.mxu0 %v6310_v13 }
 0x3ad   : > { %5042 = vmatprep.subr.bf16.mxu0 %v6325_v25 }
 0x3af   : > { %4440 = vmatmul.mubr.f32.gmra.mrb[12].mxu0 %v6643_v26 }
 0x3b0   : > { %4442 = vmatprep.mubr.f32.mxu0 %v6667_v45  ;;  %5044 = vmatpush3.bf16.msra.mxu0 %v6325_v25 }
 0x3b1   : > { %5046 = vmatprep.subr.bf16.mxu0 %v6337_v37 }
 0x3b3   : > { %4443 = vmatmul.mubr.f32.gmra.mrb[14].mxu0 %v6664_v59 }
 0x3b4   : > { %5048 = vmatpush3.bf16.msra.mxu0 %v6337_v37  ;;  %4477 = vmatprep.mubr.f32.mxu0 %v6606_v5 }
 0x3b5   : > { %5050 = vmatprep.subr.bf16.mxu0 %v6448_v27 }
 0x3b8   : > { %5052 = vmatpush3.bf16.msra.mxu0 %v6448_v27 }
 0x3b9   : > { %5054 = vmatprep.subr.bf16.mxu0 %v6452_v52 }
 0x3bc   : > { %5056 = vmatpush3.bf16.msra.mxu0 %v6452_v52 }
 0x3bd   : > { %5058 = vmatprep.subr.bf16.mxu0 %v6456_v14 }
 0x3c0   : > { %5060 = vmatpush3.bf16.msra.mxu0 %v6456_v14 }
 0x3c1   : > { %5062 = vmatprep.subr.bf16.mxu0 %v6472_v44 }
 0x3c4   : > { %5064 = vmatpush3.bf16.msra.mxu0 %v6472_v44 }
 0x3c7   : > { %4478 = vmatmul.mubr.f32.vlgmr.msra.gmra.mrb[8].mxu0 %v6599_v41 }
 0x3c8   : > { %4480 = vmatprep.mubr.f32.mxu0 %v6625_v42 }
 0x3cb   : > { %4481 = vmatmul.mubr.f32.gmra.mrb[10].mxu0 %v6622_v54 }
 0x3cc   : > { %4483 = vmatprep.mubr.f32.mxu0 %v6649_v18 }
 0x3cf   : > { %4484 = vmatmul.mubr.f32.gmra.mrb[12].mxu0 %v6643_v26 }
 0x3d0   : > { %4486 = vmatprep.mubr.f32.mxu0 %v6667_v45 }
 0x3d3   : > { %4487 = vmatmul.mubr.f32.gmra.mrb[14].mxu0 %v6664_v59 }
 0x49a   : > { %v4479_v13 = vpop.f32.mrb[8].mxu0 }
 0x49b   : > { %v5089_v25 = vadd.f32 %v4479_v13, %v3257_v30  ;;  %v3083_v37 = vpop.f32.mrb[9].mxu0 }
 0x49c   : > { %v5090_v27 = vadd.f32 %v3257_v30, %v3083_v37 }
 0x49d   : > { %v3130_v52 = vmax.f32 %v5089_v25, 0.0 }
 0x49e   : > { %v3129_v14 = vmax.f32 %v5090_v27, 0.0  ;;  %v4482_v44 = vpop.f32.mrb[10].mxu0 }
 0x49f   : > { %3138 = vst [vmem:[%s203_s5 + $0x8] sm:$0xff] %v3130_v52  ;;  %v5091_v1 = vadd.f32 %v4482_v44, %v3257_v30  ;;  %v3095_v17 = vpop.f32.mrb[11].mxu0 }
 0x4a0   : > { %3137 = vst [vmem:[%s203_s5] sm:$0xff] %v3129_v14  ;;  %v5092_v42 = vadd.f32 %v3257_v30, %v3095_v17 }
 0x4a1   : > { %v3132_v34 = vmax.f32 %v5091_v1, 0.0 }
 0x4a2   : > { %v3131_v54 = vmax.f32 %v5092_v42, 0.0  ;;  %v4485_v26 = vpop.f32.mrb[12].mxu0 }
 0x4a3   : > { %3140 = vst [vmem:[%s203_s5 + $0x18] sm:$0xff] %v3132_v34  ;;  %v5093_v41 = vadd.f32 %v4485_v26, %v3257_v30  ;;  %v3107_v5 = vpop.f32.mrb[13].mxu0 }
 0x4a4   : > { %3139 = vst [vmem:[%s203_s5 + $0x10] sm:$0xff] %v3131_v54  ;;  %v5094_v18 = vadd.f32 %v3257_v30, %v3107_v5 }
 0x4a5   : > { %v3134_v59 = vmax.f32 %v5093_v41, 0.0 }
 0x4a6   : > { %v3133_v45 = vmax.f32 %v5094_v18, 0.0  ;;  %v4488_v48 = vpop.f32.mrb[14].mxu0 }
 0x4a7   : > { %3142 = vst [vmem:[%s203_s5 + $0x28] sm:$0xff] %v3134_v59  ;;  %v5095_v55 = vadd.f32 %v4488_v48, %v3257_v30  ;;  %v3119_v33 = vpop.f32.mrb[15].mxu0 }
 0x4a8   : > { %3141 = vst [vmem:[%s203_s5 + $0x20] sm:$0xff] %v3133_v45  ;;  %v5096_v63 = vadd.f32 %v3257_v30, %v3119_v33 }
 0x4a9   : > { %v3136_v20 = vmax.f32 %v5095_v55, 0.0 }
 0x4aa   : > { %v3135_v43 = vmax.f32 %v5096_v63, 0.0 }
 0x4ab   : > { %3144 = vst [vmem:[%s203_s5 + $0x38] sm:$0xff] %v3136_v20 }
 0x4ac   : > { %3143 = vst [vmem:[%s203_s5 + $0x30] sm:$0xff] %v3135_v43 }
 0x4ad   : > { %5341 = shalt.err (!%p5338_p7)
}
 0x4ae   : > { %s5342_s26 = scalar_lea.hbm %s6838_s29, 1024  ;;  %s5346_s8 = scalar_lea.hbm %s6885_s3, 2048 }
 0x4af   : > { %p5343_p9 = scmp.ne.s32.totalorder %s6838_s29, %s5342_s26  ;;  %p5347_p5 = scmp.lt.u32.totalorder %s6838_s29, %s6885_s3 }
 0x4b0   : > { %p5348_p11 = scmp.lt.u32.totalorder %s5346_s8, %s5342_s26  ;;  %p5350_p4 = scmp.lt.u32.totalorder %s5342_s26, %s6838_s29 }
 0x4b1   : > { %p5344_p1 = pnand %p5343_p9, %p5521_p12 }
 0x4b2   : > { %p5349_p2 = por %p5348_p11, %p5347_p5 }
 0x4b3   : > { %p5345_p0 = pneg %p5344_p1 }
 0x4b4   : > { %p5351_p6 = por %p5350_p4, %p5349_p2 }
 0x4b6   : > { %p5352_p8 = pnand %p5351_p6, %p5345_p0 }
 0x4b8   : > { %5355 = shalt.err (!%p5352_p8)
}
 0x4b9   : > { %s5405_s25 = smov 128   ;;  %s5406_s5 = smov 8  }
 0x4ba   : > { %5215 = dma.vmem_to_hbm [thread:$0]  (%p5521_p12), %s6833_s11, 1024, %s6838_s29, %s3146_s16, %s5405_s25, %s5405_s25, %s5406_s5  }
 0x4bb PF: > { %s3174_s27 = sand.u32 1, %s5386_s12   ;;  %p7047_p10 = scmp.ne.s32.totalorder %s6956_s19, 0 }
 0x4bc   : > { %p7048_p13 = scmp.ge.s32.totalorder %s5398_s15, 2  ;;  %s3175_s28 = scalar_lea.sflag [#allocation4], %s3174_s27 }
 0x4be   : > { %p5226_p3 = pnand %p7048_p13, %p7047_p10 }
 0x4c0   : > { %5381 = dma.done.wait (!%p5226_p3), %s3175_s28, 1024  }
 0x4c1   : > { %5383 = vsyncadd (!%p5226_p3), %s3175_s28, 4294966272  ;;  %p17_p7 = scmp.ge.s32.totalorder %s5483_s24, 4   ;;  %s7049_s12 = smov %s5390_s13 }
 0x4c2   : > { %s7050_s13 = smov %s5394_s14  ;;  %s7051_s14 = smov %s5517_s17 }
 0x4c3   : > { %s7052_s15 = smov %s5483_s24  ;;  %19 = sbr.rel (!%p17_p7) target bundleno = 6 (0x6), region = 85 }
 0x4ca   :  { %3180 = vsyncpa [#allocation3], 1 }
 0x4cb   :  { %3182 = vsyncpa [#allocation3 + $0x1], 1 }
 0x4cc   :  { %3183 = vsyncpa [#allocation6], 1 }
 0x4cd   :  { %3184 = vsyncpa [#allocation4], 1 }
 0x4ce   :  { %3186 = vsyncpa [#allocation4 + $0x1], 1 }

</bundles_post_ra>
